<compile_context>
chip_gen: v6e
topology: v6e:2x2x1
jax: 0.10.0
libtpu: 0.0.40
codegen_flags: <defaults>
</compile_context>

<pallas_src>
import functools

import jax
import jax.numpy as jnp
from jax.experimental import pallas as pl
from jax.experimental.pallas import tpu as pltpu

LN_EPS = 1e-5  # PyTorch nn.LayerNorm default eps


def _ln_noaffine(x):
    m = jnp.mean(x, axis=-1, keepdims=True)
    c = x - m
    var = jnp.mean(c * c, axis=-1, keepdims=True)
    return c * jax.lax.rsqrt(var + LN_EPS)


def slot_attention_kernel(
    x_ref, s0_ref, vec_ref,
    wkv_ref, wq_ref, wgru_ref, w1_ref, w2_ref,
    out_ref,
    *, num_iterations, tb, N, S, D, H, epsilon):
    f32 = jnp.float32
    M = tb * S          # rows of the slot-shaped matmuls
    Mi = tb * N         # rows of the input-shaped matmuls

    # ---- unpack the packed vector-parameter slab (one load, static slices) ----
    V = vec_ref[...]
    b_kv  = V[0:1, :2 * D]     # ln_in bias folded through [wk|wv]
    b_q   = V[1:2, :D]         # ln_slot bias folded through wq
    b_gru = V[2:3, :4 * D]     # [b_ih_rz + b_hh_rz | b_ih_n | b_hh_n]
    b_m1  = V[3:4, :H]         # ln_mlp bias folded through w1  + mlp_b1
    b_m2  = V[4:5, :D]         # mlp_b2
    mu    = V[5:6, :D]
    sigma = V[6:7, :D]         # exp(log_sigma), pre-computed host-side

    # hoist loop-invariant broadcasts out of the unrolled loop
    b_q_b   = jnp.broadcast_to(b_q, (M, D))
    b_gru_b = jnp.broadcast_to(b_gru, (M, 4 * D))
    b_m1_b  = jnp.broadcast_to(b_m1, (M, H))
    b_m2_b  = jnp.broadcast_to(b_m2, (M, D))

    # hoist weight loads
    wkv = wkv_ref[...]
    wq = wq_ref[...]
    wgru = wgru_ref[...]
    w1 = w1_ref[...]
    w2 = w2_ref[...]

    # ---- input projections: LN (no affine; folded) + fused k|v matmul ----
    x = _ln_noaffine(x_ref[...].astype(f32))                       # (tb*N, D)
    kv = jnp.dot(x, wkv, preferred_element_type=f32) + jnp.broadcast_to(b_kv, (Mi, 2 * D))
    scale = D ** (-0.5)
    k = (kv[:, :D] * scale).reshape(tb, N, D)   # fold attention scale into k once
    v = kv[:, D:].reshape(tb, N, D)

    # slots = mu + exp(log_sigma) * randn
    slots = mu + sigma * s0_ref[...].astype(f32)                   # (tb*S, D)

    for _ in range(num_iterations):
        slots_prev = slots

        # q = LN(slots) @ wq  (LN affine folded into wq / b_q)
        q = (jnp.dot(_ln_noaffine(slots), wq, preferred_element_type=f32)
             + b_q_b).reshape(tb, S, D)

        # attention over slots (softmax on last axis), renormalize over inputs
        logits = jnp.einsum("bnd,bsd->bns", k, q,
                            preferred_element_type=f32)            # (tb, N, S)
        logits = logits - jnp.max(logits, axis=-1, keepdims=True)
        e = jnp.exp(logits)
        attn = e * pl.reciprocal(jnp.sum(e, axis=-1, keepdims=True), approx=True)
        attn = attn + epsilon
        attn = attn * pl.reciprocal(jnp.sum(attn, axis=1, keepdims=True),
                                    approx=True)                   # dim=1 renorm
        updates = jnp.einsum("bns,bnd->bsd", attn, v,              # attn^T @ v
                             preferred_element_type=f32).reshape(M, D)

        # ---- GRUCell(updates, slots_prev): ONE fused MXU dot ----
        # g = [updates | slots_prev] @ W_gru + b_gru
        #   columns: [:2D] = (gi+gh)_{r,z} ; [2D:3D] = gi_n ; [3D:4D] = gh_n
        g = jnp.dot(jnp.concatenate([updates, slots_prev], axis=1), wgru,
                    preferred_element_type=f32) + b_gru_b
        rz = jax.nn.sigmoid(g[:, :2 * D])
        r, z = rz[:, :D], rz[:, D:]
        n = jnp.tanh(g[:, 2 * D:3 * D] + r * g[:, 3 * D:])
        slots = (1.0 - z) * n + z * slots_prev

        # ---- residual MLP (LN affine folded into w1 / b_m1) ----
        h1 = jnp.maximum(
            jnp.dot(_ln_noaffine(slots), w1, preferred_element_type=f32) + b_m1_b,
            0.0)
        slots = slots + jnp.dot(h1, w2, preferred_element_type=f32) + b_m2_b

    out_ref[...] = slots.astype(out_ref.dtype)


def slot_attention(inputs, slots_init, params, *, num_iterations, num_slots,
                   slot_size, epsilon=1e-8, tb=None):
    B, N, Din = inputs.shape
    S, D = num_slots, slot_size
    assert Din == D, "project_k/v require in_features == slot_size"
    H = params["mlp_w1"].shape[0]
    f32 = jnp.float32

    # batch several examples per grid step to amortize grid-step/DMA overhead
    if tb is None:
        tb = B if B <= 8 else 8
    assert B % tb == 0, "tb must divide B"
    assert tb == B or ((tb * N) % 8 == 0 and (tb * S) % 8 == 0)
    nb = B // tb

    p = {k: jnp.asarray(vv, f32) for k, vv in params.items()}

    # ---- host-side (free) weight fusions / foldings ----
    ln_in_w = p["ln_in_w"].reshape(-1); ln_in_b = p["ln_in_b"].reshape(-1)
    ln_sl_w = p["ln_slot_w"].reshape(-1); ln_sl_b = p["ln_slot_b"].reshape(-1)
    ln_ml_w = p["ln_mlp_w"].reshape(-1); ln_ml_b = p["ln_mlp_b"].reshape(-1)

    # fused k|v projection, ln_in affine folded in
    wkv_t = jnp.concatenate([p["wk"].T, p["wv"].T], axis=1)          # (D, 2D)
    wkv_f = ln_in_w[:, None] * wkv_t
    b_kv = ln_in_b @ wkv_t                                           # (2D,)

    # q projection, ln_slot affine folded in
    wq_t = p["wq"].T                                                 # (D, D)
    wq_f = ln_sl_w[:, None] * wq_t
    b_q = ln_sl_b @ wq_t                                             # (D,)

    # fused GRU weight: [updates | slots_prev] (M,2D) @ (2D,4D)
    wih_t = p["w_ih"].T                                              # (D, 3D)
    whh_t = p["w_hh"].T                                              # (D, 3D)
    zD = jnp.zeros((D, D), f32)
    w_gru = jnp.concatenate([
        jnp.concatenate([wih_t[:, :2 * D], wih_t[:, 2 * D:], zD], axis=1),
        jnp.concatenate([whh_t[:, :2 * D], zD, whh_t[:, 2 * D:]], axis=1)],
        axis=0)                                                      # (2D, 4D)
    b_ih = p["b_ih"].reshape(-1); b_hh = p["b_hh"].reshape(-1)
    b_gru = jnp.concatenate([b_ih[:2 * D] + b_hh[:2 * D],
                             b_ih[2 * D:], b_hh[2 * D:]])            # (4D,)

    # MLP, ln_mlp affine folded into the first linear
    w1_t = p["mlp_w1"].T                                             # (D, H)
    w1_f = ln_ml_w[:, None] * w1_t
    b_m1 = ln_ml_b @ w1_t + p["mlp_b1"].reshape(-1)                  # (H,)
    w2_t = p["mlp_w2"].T                                             # (H, D)
    b_m2 = p["mlp_b2"].reshape(-1)                                   # (D,)

    mu = p["mu"].reshape(-1)
    sigma = jnp.exp(p["log_sigma"].reshape(-1))

    # pack the small vectors into one lane-padded slab (<= one vreg tile)
    vec_list = [b_kv, b_q, b_gru, b_m1, b_m2, mu, sigma]
    W = max(v.shape[0] for v in vec_list)
    W = ((W + 127) // 128) * 128
    rows = [jnp.pad(v, (0, W - v.shape[0])) for v in vec_list]
    while len(rows) % 8 != 0:
        rows.append(jnp.zeros((W,), f32))
    vecs = jnp.stack(rows, axis=0)                                   # (8, W)

    # flatten batch into the leading (sublane) dim: wide 2-D blocks
    x2 = inputs.reshape(B * N, D)
    s2 = slots_init.reshape(B * S, D)

    kernel = functools.partial(
        slot_attention_kernel, num_iterations=num_iterations,
        tb=tb, N=N, S=S, D=D, H=H, epsilon=epsilon)

    weights = [wkv_f, wq_f, w_gru, w1_f, w2_t]

    def full2d(a):
        return pl.BlockSpec(a.shape, lambda b: (0, 0))

    out = pl.pallas_call(
        kernel,
        out_shape=jax.ShapeDtypeStruct((B * S, D), inputs.dtype),
        grid=(nb,),
        in_specs=[pl.BlockSpec((tb * N, D), lambda b: (b, 0)),
                  pl.BlockSpec((tb * S, D), lambda b: (b, 0)),
                  full2d(vecs)] + [full2d(w) for w in weights],
        out_specs=pl.BlockSpec((tb * S, D), lambda b: (b, 0)),
        compiler_params=pltpu.CompilerParams(
            dimension_semantics=("parallel",)),
    )(x2, s2, vecs, *weights)
    return out.reshape(B, S, D)


# ---------------- pure-JAX reference (same math, for verification) ------------
def _layer_norm(x, w, b):
    m = jnp.mean(x, axis=-1, keepdims=True)
    var = jnp.mean(jnp.square(x - m), axis=-1, keepdims=True)
    return (x - m) * jax.lax.rsqrt(var + LN_EPS) * w + b


def slot_attention_ref(inputs, slots_init, p, *, num_iterations, slot_size,
                       epsilon=1e-8):
    D = slot_size
    x = _layer_norm(inputs, p["ln_in_w"], p["ln_in_b"])
    k = jnp.einsum("bnd,ed->bne", x, p["wk"])
    v = jnp.einsum("bnd,ed->bne", x, p["wv"])
    slots = p["mu"][None] + jnp.exp(p["log_sigma"][None]) * slots_init
    scale = D ** (-0.5)
    for _ in range(num_iterations):
        slots_prev = slots
        sn = _layer_norm(slots, p["ln_slot_w"], p["ln_slot_b"])
        q = jnp.einsum("bsd,ed->bse", sn, p["wq"])
        logits = scale * jnp.einsum("bnd,bsd->bns", k, q)
        attn = jax.nn.softmax(logits, axis=-1) + epsilon
        attn = attn / jnp.sum(attn, axis=1, keepdims=True)
        updates = jnp.einsum("bns,bnd->bsd", attn, v)
        gi = jnp.einsum("bsd,gd->bsg", updates, p["w_ih"]) + p["b_ih"]
        gh = jnp.einsum("bsd,gd->bsg", slots_prev, p["w_hh"]) + p["b_hh"]
        i_r, i_z, i_n = gi[..., :D], gi[..., D:2 * D], gi[..., 2 * D:]
        h_r, h_z, h_n = gh[..., :D], gh[..., D:2 * D], gh[..., 2 * D:]
        r = jax.nn.sigmoid(i_r + h_r)
        z = jax.nn.sigmoid(i_z + h_z)
        n = jnp.tanh(i_n + r * h_n)
        slots = (1.0 - z) * n + z * slots_prev
        sm = _layer_norm(slots, p["ln_mlp_w"], p["ln_mlp_b"])
        h1 = jax.nn.relu(jnp.einsum("bsd,hd->bsh", sm, p["mlp_w1"]) + p["mlp_b1"])
        slots = slots + jnp.einsum("bsh,dh->bsd", h1, p["mlp_w2"]) + p["mlp_b2"]
    return slots


if __name__ == "__main__":
    # Small shapes implied by the module: in_features == slot_size.
    B, N = 2, 16          # batch, num_inputs
    D, S, H = 32, 8, 64   # slot_size (= in_features), num_slots, mlp_hidden_size
    NUM_ITERS = 3
    EPS = 1e-8

    key = jax.random.PRNGKey(0)
    ks = jax.random.split(key, 22)
    f32 = jnp.float32

    # non-trivial LayerNorm affines to exercise the host-side folding
    params = {
        "ln_in_w": 1.0 + 0.1 * jax.random.normal(ks[0], (1, D), f32),
        "ln_in_b": 0.05 * jax.random.normal(ks[1], (1, D), f32),
        "ln_slot_w": 1.0 + 0.1 * jax.random.normal(ks[2], (1, D), f32),
        "ln_slot_b": 0.05 * jax.random.normal(ks[3], (1, D), f32),
        "ln_mlp_w": 1.0 + 0.1 * jax.random.normal(ks[4], (1, D), f32),
        "ln_mlp_b": 0.05 * jax.random.normal(ks[5], (1, D), f32),
        "wq": 0.1 * jax.random.normal(ks[6], (D, D), f32),
        "wk": 0.1 * jax.random.normal(ks[7], (D, D), f32),
        "wv": 0.1 * jax.random.normal(ks[8], (D, D), f32),
        "w_ih": 0.1 * jax.random.normal(ks[9], (3 * D, D), f32),
        "w_hh": 0.1 * jax.random.normal(ks[10], (3 * D, D), f32),
        "b_ih": 0.05 * jax.random.normal(ks[11], (1, 3 * D), f32),
        "b_hh": 0.05 * jax.random.normal(ks[12], (1, 3 * D), f32),
        "mlp_w1": 0.1 * jax.random.normal(ks[13], (H, D), f32),
        "mlp_b1": 0.05 * jax.random.normal(ks[14], (1, H), f32),
        "mlp_w2": 0.1 * jax.random.normal(ks[15], (D, H), f32),
        "mlp_b2": 0.05 * jax.random.normal(ks[16], (1, D), f32),
        "mu": 0.1 * jax.random.normal(ks[17], (1, D), f32),
        "log_sigma": 0.1 * jax.random.normal(ks[18], (1, D), f32),
    }

    inputs = jax.random.normal(ks[19], (B, N, D), f32)
    # torch.randn in forward() -> supplied explicitly so the kernel is deterministic
    slots_init = jax.random.normal(ks[20], (B, S, D), f32)

    out = slot_attention(inputs, slots_init, params,
                         num_iterations=NUM_ITERS, num_slots=S,
                         slot_size=D, epsilon=EPS)
    out = jax.block_until_ready(out)

    ref = slot_attention_ref(inputs, slots_init, params,
                             num_iterations=NUM_ITERS, slot_size=D, epsilon=EPS)
    assert out.shape == (B, S, D)
    # tolerance covers the EUP approx reciprocal in softmax/renorm (~1e-4 rel)
    assert jnp.allclose(out, ref, rtol=5e-3, atol=5e-3), "mismatch vs. reference"

    print("KERNEL_OK")
</pallas_src>

<mosaic_0001>
module attributes {stable_mosaic.version = 11 : i64} {
  func.func @slot_attention_kernel(%arg0: i32, %arg1: memref<32x32xf32, #tpu.memory_space<vmem>>, %arg2: memref<16x32xf32, #tpu.memory_space<vmem>>, %arg3: memref<8x128xf32, #tpu.memory_space<vmem>>, %arg4: memref<32x64xf32, #tpu.memory_space<vmem>>, %arg5: memref<32x32xf32, #tpu.memory_space<vmem>>, %arg6: memref<64x128xf32, #tpu.memory_space<vmem>>, %arg7: memref<32x64xf32, #tpu.memory_space<vmem>>, %arg8: memref<64x32xf32, #tpu.memory_space<vmem>>, %arg9: memref<16x32xf32, #tpu.memory_space<vmem>>) attributes {dimension_semantics = [#tpu.dimension_semantics<parallel>], iteration_bounds = array<i64: 1>, scalar_prefetch = 0 : i64, scratch_operands = 0 : i64, tpu.core_type = #tpu.core_type<tc>, window_params = [{transform_indices = @transform_0, window_bounds = array<i64: 32, 32>}, {transform_indices = @transform_1, window_bounds = array<i64: 16, 32>}, {pipeline_mode = #tpu.pipeline_mode<synchronous>, transform_indices = @transform_2, window_bounds = array<i64: 8, 128>}, {pipeline_mode = #tpu.pipeline_mode<synchronous>, transform_indices = @transform_3, window_bounds = array<i64: 32, 64>}, {pipeline_mode = #tpu.pipeline_mode<synchronous>, transform_indices = @transform_4, window_bounds = array<i64: 32, 32>}, {pipeline_mode = #tpu.pipeline_mode<synchronous>, transform_indices = @transform_5, window_bounds = array<i64: 64, 128>}, {pipeline_mode = #tpu.pipeline_mode<synchronous>, transform_indices = @transform_6, window_bounds = array<i64: 32, 64>}, {pipeline_mode = #tpu.pipeline_mode<synchronous>, transform_indices = @transform_7, window_bounds = array<i64: 64, 32>}, {transform_indices = @transform_8, window_bounds = array<i64: 16, 32>}]} {
    %c0 = arith.constant 0 : index
    %c0_0 = arith.constant 0 : index
    %0 = vector.load %arg3[%c0, %c0_0] : memref<8x128xf32, #tpu.memory_space<vmem>>, vector<8x128xf32>
    %1 = vector.extract_strided_slice %0 {offsets = [0, 0], sizes = [1, 64], strides = [1, 1]} : vector<8x128xf32> to vector<1x64xf32>
    %2 = vector.extract_strided_slice %0 {offsets = [1, 0], sizes = [1, 32], strides = [1, 1]} : vector<8x128xf32> to vector<1x32xf32>
    %3 = vector.extract_strided_slice %0 {offsets = [2, 0], sizes = [1, 128], strides = [1, 1]} : vector<8x128xf32> to vector<1x128xf32>
    %4 = vector.extract_strided_slice %0 {offsets = [3, 0], sizes = [1, 64], strides = [1, 1]} : vector<8x128xf32> to vector<1x64xf32>
    %5 = vector.extract_strided_slice %0 {offsets = [4, 0], sizes = [1, 32], strides = [1, 1]} : vector<8x128xf32> to vector<1x32xf32>
    %6 = vector.extract_strided_slice %0 {offsets = [5, 0], sizes = [1, 32], strides = [1, 1]} : vector<8x128xf32> to vector<1x32xf32>
    %7 = vector.extract_strided_slice %0 {offsets = [6, 0], sizes = [1, 32], strides = [1, 1]} : vector<8x128xf32> to vector<1x32xf32>
    %8 = vector.shape_cast %2 : vector<1x32xf32> to vector<1x32xf32>
    %9 = vector.broadcast %8 : vector<1x32xf32> to vector<16x32xf32>
    %10 = vector.shape_cast %3 : vector<1x128xf32> to vector<1x128xf32>
    %11 = vector.broadcast %10 : vector<1x128xf32> to vector<16x128xf32>
    %12 = vector.shape_cast %4 : vector<1x64xf32> to vector<1x64xf32>
    %13 = vector.broadcast %12 : vector<1x64xf32> to vector<16x64xf32>
    %14 = vector.shape_cast %5 : vector<1x32xf32> to vector<1x32xf32>
    %15 = vector.broadcast %14 : vector<1x32xf32> to vector<16x32xf32>
    %c0_1 = arith.constant 0 : index
    %c0_2 = arith.constant 0 : index
    %16 = vector.load %arg4[%c0_1, %c0_2] : memref<32x64xf32, #tpu.memory_space<vmem>>, vector<32x64xf32>
    %c0_3 = arith.constant 0 : index
    %c0_4 = arith.constant 0 : index
    %17 = vector.load %arg5[%c0_3, %c0_4] : memref<32x32xf32, #tpu.memory_space<vmem>>, vector<32x32xf32>
    %c0_5 = arith.constant 0 : index
    %c0_6 = arith.constant 0 : index
    %18 = vector.load %arg6[%c0_5, %c0_6] : memref<64x128xf32, #tpu.memory_space<vmem>>, vector<64x128xf32>
    %c0_7 = arith.constant 0 : index
    %c0_8 = arith.constant 0 : index
    %19 = vector.load %arg7[%c0_7, %c0_8] : memref<32x64xf32, #tpu.memory_space<vmem>>, vector<32x64xf32>
    %c0_9 = arith.constant 0 : index
    %c0_10 = arith.constant 0 : index
    %20 = vector.load %arg8[%c0_9, %c0_10] : memref<64x32xf32, #tpu.memory_space<vmem>>, vector<64x32xf32>
    %c0_11 = arith.constant 0 : index
    %c0_12 = arith.constant 0 : index
    %21 = vector.load %arg1[%c0_11, %c0_12] : memref<32x32xf32, #tpu.memory_space<vmem>>, vector<32x32xf32>
    %cst = arith.constant dense<0.000000e+00> : vector<32xf32>
    %22 = vector.multi_reduction <add>, %21, %cst [1] : vector<32x32xf32> to vector<32xf32>
    %23 = vector.shape_cast %22 : vector<32xf32> to vector<32x1xf32>
    %cst_13 = arith.constant 3.200000e+01 : f32
    %24 = vector.broadcast %cst_13 : f32 to vector<32x1xf32>
    %25 = arith.divf %23, %24 : vector<32x1xf32>
    %26 = vector.broadcast %25 : vector<32x1xf32> to vector<32x32xf32>
    %27 = arith.subf %21, %26 : vector<32x32xf32>
    %28 = arith.mulf %27, %27 : vector<32x32xf32>
    %cst_14 = arith.constant dense<0.000000e+00> : vector<32xf32>
    %29 = vector.multi_reduction <add>, %28, %cst_14 [1] : vector<32x32xf32> to vector<32xf32>
    %30 = vector.shape_cast %29 : vector<32xf32> to vector<32x1xf32>
    %cst_15 = arith.constant 3.200000e+01 : f32
    %31 = vector.broadcast %cst_15 : f32 to vector<32x1xf32>
    %32 = arith.divf %30, %31 : vector<32x1xf32>
    %cst_16 = arith.constant 9.99999974E-6 : f32
    %33 = vector.broadcast %cst_16 : f32 to vector<32x1xf32>
    %34 = arith.addf %32, %33 : vector<32x1xf32>
    %35 = math.rsqrt %34 : vector<32x1xf32>
    %36 = vector.broadcast %35 : vector<32x1xf32> to vector<32x32xf32>
    %37 = arith.mulf %27, %36 : vector<32x32xf32>
    %cst_17 = arith.constant dense<0.000000e+00> : vector<32x64xf32>
    %38 = tpu.matmul %37, %16, %cst_17 {dimension_numbers = #tpu.dot_dimension_numbers<[1], [0], [0], [1], [0, 0, 1, 1], [], []>} : vector<32x32xf32>, vector<32x64xf32>, vector<32x64xf32> -> vector<32x64xf32>
    %39 = vector.shape_cast %1 : vector<1x64xf32> to vector<1x64xf32>
    %40 = vector.broadcast %39 : vector<1x64xf32> to vector<32x64xf32>
    %41 = arith.addf %38, %40 : vector<32x64xf32>
    %42 = vector.extract_strided_slice %41 {offsets = [0, 0], sizes = [32, 32], strides = [1, 1]} : vector<32x64xf32> to vector<32x32xf32>
    %cst_18 = arith.constant 0.176776692 : f32
    %43 = vector.broadcast %cst_18 : f32 to vector<32x32xf32>
    %44 = arith.mulf %42, %43 : vector<32x32xf32>
    %45 = vector.shape_cast %44 : vector<32x32xf32> to vector<2x16x32xf32>
    %46 = vector.extract_strided_slice %41 {offsets = [0, 32], sizes = [32, 32], strides = [1, 1]} : vector<32x64xf32> to vector<32x32xf32>
    %47 = vector.shape_cast %46 : vector<32x32xf32> to vector<2x16x32xf32>
    %c0_19 = arith.constant 0 : index
    %c0_20 = arith.constant 0 : index
    %48 = vector.load %arg2[%c0_19, %c0_20] : memref<16x32xf32, #tpu.memory_space<vmem>>, vector<16x32xf32>
    %49 = vector.broadcast %7 : vector<1x32xf32> to vector<16x32xf32>
    %50 = arith.mulf %49, %48 : vector<16x32xf32>
    %51 = vector.broadcast %6 : vector<1x32xf32> to vector<16x32xf32>
    %52 = arith.addf %51, %50 : vector<16x32xf32>
    %cst_21 = arith.constant dense<0.000000e+00> : vector<16xf32>
    %53 = vector.multi_reduction <add>, %52, %cst_21 [1] : vector<16x32xf32> to vector<16xf32>
    %54 = vector.shape_cast %53 : vector<16xf32> to vector<16x1xf32>
    %cst_22 = arith.constant 3.200000e+01 : f32
    %55 = vector.broadcast %cst_22 : f32 to vector<16x1xf32>
    %56 = arith.divf %54, %55 : vector<16x1xf32>
    %57 = vector.broadcast %56 : vector<16x1xf32> to vector<16x32xf32>
    %58 = arith.subf %52, %57 : vector<16x32xf32>
    %59 = arith.mulf %58, %58 : vector<16x32xf32>
    %cst_23 = arith.constant dense<0.000000e+00> : vector<16xf32>
    %60 = vector.multi_reduction <add>, %59, %cst_23 [1] : vector<16x32xf32> to vector<16xf32>
    %61 = vector.shape_cast %60 : vector<16xf32> to vector<16x1xf32>
    %cst_24 = arith.constant 3.200000e+01 : f32
    %62 = vector.broadcast %cst_24 : f32 to vector<16x1xf32>
    %63 = arith.divf %61, %62 : vector<16x1xf32>
    %cst_25 = arith.constant 9.99999974E-6 : f32
    %64 = vector.broadcast %cst_25 : f32 to vector<16x1xf32>
    %65 = arith.addf %63, %64 : vector<16x1xf32>
    %66 = math.rsqrt %65 : vector<16x1xf32>
    %67 = vector.broadcast %66 : vector<16x1xf32> to vector<16x32xf32>
    %68 = arith.mulf %58, %67 : vector<16x32xf32>
    %cst_26 = arith.constant dense<0.000000e+00> : vector<16x32xf32>
    %69 = tpu.matmul %68, %17, %cst_26 {dimension_numbers = #tpu.dot_dimension_numbers<[1], [0], [0], [1], [0, 0, 1, 1], [], []>} : vector<16x32xf32>, vector<32x32xf32>, vector<16x32xf32> -> vector<16x32xf32>
    %70 = arith.addf %69, %9 : vector<16x32xf32>
    %71 = vector.shape_cast %70 : vector<16x32xf32> to vector<2x8x32xf32>
    "tpu.trace_start"() <{level = 10 : i32, message = "bnd,bsd->bns"}> : () -> ()
    %cst_27 = arith.constant dense<0.000000e+00> : vector<2x16x8xf32>
    %72 = tpu.matmul %45, %71, %cst_27 {dimension_numbers = #tpu.dot_dimension_numbers<[2], [2], [1], [1], [0, 0, 0, 1, 1, 1], [0], [0]>} : vector<2x16x32xf32>, vector<2x8x32xf32>, vector<2x16x8xf32> -> vector<2x16x8xf32>
    "tpu.trace_stop"() : () -> ()
    %cst_28 = arith.constant dense<0xFF800000> : vector<2x16xf32>
    %73 = vector.multi_reduction <maximumf>, %72, %cst_28 [2] : vector<2x16x8xf32> to vector<2x16xf32>
    %74 = vector.shape_cast %73 : vector<2x16xf32> to vector<2x16x1xf32>
    %75 = vector.broadcast %74 : vector<2x16x1xf32> to vector<2x16x8xf32>
    %76 = arith.subf %72, %75 : vector<2x16x8xf32>
    %77 = math.exp %76 : vector<2x16x8xf32>
    %cst_29 = arith.constant dense<0.000000e+00> : vector<2x16xf32>
    %78 = vector.multi_reduction <add>, %77, %cst_29 [2] : vector<2x16x8xf32> to vector<2x16xf32>
    %79 = vector.shape_cast %78 : vector<2x16xf32> to vector<2x16x1xf32>
    %80 = tpu.reciprocal %79 {approx = true} : vector<2x16x1xf32> -> vector<2x16x1xf32>
    %81 = vector.broadcast %80 : vector<2x16x1xf32> to vector<2x16x8xf32>
    %82 = arith.mulf %77, %81 : vector<2x16x8xf32>
    %cst_30 = arith.constant 9.99999993E-9 : f32
    %83 = vector.broadcast %cst_30 : f32 to vector<2x16x8xf32>
    %84 = arith.addf %82, %83 : vector<2x16x8xf32>
    %cst_31 = arith.constant dense<0.000000e+00> : vector<2x8xf32>
    %85 = vector.multi_reduction <add>, %84, %cst_31 [1] : vector<2x16x8xf32> to vector<2x8xf32>
    %86 = vector.shape_cast %85 : vector<2x8xf32> to vector<2x1x8xf32>
    %87 = tpu.reciprocal %86 {approx = true} : vector<2x1x8xf32> -> vector<2x1x8xf32>
    %88 = vector.broadcast %87 : vector<2x1x8xf32> to vector<2x16x8xf32>
    %89 = arith.mulf %84, %88 : vector<2x16x8xf32>
    "tpu.trace_start"() <{level = 10 : i32, message = "bns,bnd->bsd"}> : () -> ()
    %cst_32 = arith.constant dense<0.000000e+00> : vector<2x8x32xf32>
    %90 = tpu.matmul %89, %47, %cst_32 {dimension_numbers = #tpu.dot_dimension_numbers<[1], [1], [2], [2], [0, 0, 0, 2, 1, 2], [0], [0]>} : vector<2x16x8xf32>, vector<2x16x32xf32>, vector<2x8x32xf32> -> vector<2x8x32xf32>
    "tpu.trace_stop"() : () -> ()
    %91 = vector.shape_cast %90 : vector<2x8x32xf32> to vector<16x32xf32>
    %92 = tpu.concatenate %91, %52 in 1 : vector<16x32xf32>, vector<16x32xf32> -> vector<16x64xf32>
    %cst_33 = arith.constant dense<0.000000e+00> : vector<16x128xf32>
    %93 = tpu.matmul %92, %18, %cst_33 {dimension_numbers = #tpu.dot_dimension_numbers<[1], [0], [0], [1], [0, 0, 1, 1], [], []>} : vector<16x64xf32>, vector<64x128xf32>, vector<16x128xf32> -> vector<16x128xf32>
    %94 = arith.addf %93, %11 : vector<16x128xf32>
    %95 = vector.extract_strided_slice %94 {offsets = [0, 0], sizes = [16, 64], strides = [1, 1]} : vector<16x128xf32> to vector<16x64xf32>
    %96 = arith.negf %95 : vector<16x64xf32>
    %97 = math.exp %96 : vector<16x64xf32>
    %cst_34 = arith.constant 1.000000e+00 : f32
    %98 = vector.broadcast %cst_34 : f32 to vector<16x64xf32>
    %99 = arith.addf %98, %97 : vector<16x64xf32>
    %100 = arith.divf %98, %99 : vector<16x64xf32>
    %101 = vector.extract_strided_slice %100 {offsets = [0, 0], sizes = [16, 32], strides = [1, 1]} : vector<16x64xf32> to vector<16x32xf32>
    %102 = vector.extract_strided_slice %100 {offsets = [0, 32], sizes = [16, 32], strides = [1, 1]} : vector<16x64xf32> to vector<16x32xf32>
    %103 = vector.extract_strided_slice %94 {offsets = [0, 64], sizes = [16, 32], strides = [1, 1]} : vector<16x128xf32> to vector<16x32xf32>
    %104 = vector.extract_strided_slice %94 {offsets = [0, 96], sizes = [16, 32], strides = [1, 1]} : vector<16x128xf32> to vector<16x32xf32>
    %105 = arith.mulf %101, %104 : vector<16x32xf32>
    %106 = arith.addf %103, %105 : vector<16x32xf32>
    %107 = math.tanh %106 : vector<16x32xf32>
    %cst_35 = arith.constant 1.000000e+00 : f32
    %108 = vector.broadcast %cst_35 : f32 to vector<16x32xf32>
    %109 = arith.subf %108, %102 : vector<16x32xf32>
    %110 = arith.mulf %109, %107 : vector<16x32xf32>
    %111 = arith.mulf %102, %52 : vector<16x32xf32>
    %112 = arith.addf %110, %111 : vector<16x32xf32>
    %cst_36 = arith.constant dense<0.000000e+00> : vector<16xf32>
    %113 = vector.multi_reduction <add>, %112, %cst_36 [1] : vector<16x32xf32> to vector<16xf32>
    %114 = vector.shape_cast %113 : vector<16xf32> to vector<16x1xf32>
    %cst_37 = arith.constant 3.200000e+01 : f32
    %115 = vector.broadcast %cst_37 : f32 to vector<16x1xf32>
    %116 = arith.divf %114, %115 : vector<16x1xf32>
    %117 = vector.broadcast %116 : vector<16x1xf32> to vector<16x32xf32>
    %118 = arith.subf %112, %117 : vector<16x32xf32>
    %119 = arith.mulf %118, %118 : vector<16x32xf32>
    %cst_38 = arith.constant dense<0.000000e+00> : vector<16xf32>
    %120 = vector.multi_reduction <add>, %119, %cst_38 [1] : vector<16x32xf32> to vector<16xf32>
    %121 = vector.shape_cast %120 : vector<16xf32> to vector<16x1xf32>
    %cst_39 = arith.constant 3.200000e+01 : f32
    %122 = vector.broadcast %cst_39 : f32 to vector<16x1xf32>
    %123 = arith.divf %121, %122 : vector<16x1xf32>
    %cst_40 = arith.constant 9.99999974E-6 : f32
    %124 = vector.broadcast %cst_40 : f32 to vector<16x1xf32>
    %125 = arith.addf %123, %124 : vector<16x1xf32>
    %126 = math.rsqrt %125 : vector<16x1xf32>
    %127 = vector.broadcast %126 : vector<16x1xf32> to vector<16x32xf32>
    %128 = arith.mulf %118, %127 : vector<16x32xf32>
    %cst_41 = arith.constant dense<0.000000e+00> : vector<16x64xf32>
    %129 = tpu.matmul %128, %19, %cst_41 {dimension_numbers = #tpu.dot_dimension_numbers<[1], [0], [0], [1], [0, 0, 1, 1], [], []>} : vector<16x32xf32>, vector<32x64xf32>, vector<16x64xf32> -> vector<16x64xf32>
    %130 = arith.addf %129, %13 : vector<16x64xf32>
    %cst_42 = arith.constant 0.000000e+00 : f32
    %131 = vector.broadcast %cst_42 : f32 to vector<16x64xf32>
    %132 = arith.maximumf %130, %131 : vector<16x64xf32>
    %cst_43 = arith.constant dense<0.000000e+00> : vector<16x32xf32>
    %133 = tpu.matmul %132, %20, %cst_43 {dimension_numbers = #tpu.dot_dimension_numbers<[1], [0], [0], [1], [0, 0, 1, 1], [], []>} : vector<16x64xf32>, vector<64x32xf32>, vector<16x32xf32> -> vector<16x32xf32>
    %134 = arith.addf %112, %133 : vector<16x32xf32>
    %135 = arith.addf %134, %15 : vector<16x32xf32>
    %cst_44 = arith.constant dense<0.000000e+00> : vector<16xf32>
    %136 = vector.multi_reduction <add>, %135, %cst_44 [1] : vector<16x32xf32> to vector<16xf32>
    %137 = vector.shape_cast %136 : vector<16xf32> to vector<16x1xf32>
    %cst_45 = arith.constant 3.200000e+01 : f32
    %138 = vector.broadcast %cst_45 : f32 to vector<16x1xf32>
    %139 = arith.divf %137, %138 : vector<16x1xf32>
    %140 = vector.broadcast %139 : vector<16x1xf32> to vector<16x32xf32>
    %141 = arith.subf %135, %140 : vector<16x32xf32>
    %142 = arith.mulf %141, %141 : vector<16x32xf32>
    %cst_46 = arith.constant dense<0.000000e+00> : vector<16xf32>
    %143 = vector.multi_reduction <add>, %142, %cst_46 [1] : vector<16x32xf32> to vector<16xf32>
    %144 = vector.shape_cast %143 : vector<16xf32> to vector<16x1xf32>
    %cst_47 = arith.constant 3.200000e+01 : f32
    %145 = vector.broadcast %cst_47 : f32 to vector<16x1xf32>
    %146 = arith.divf %144, %145 : vector<16x1xf32>
    %cst_48 = arith.constant 9.99999974E-6 : f32
    %147 = vector.broadcast %cst_48 : f32 to vector<16x1xf32>
    %148 = arith.addf %146, %147 : vector<16x1xf32>
    %149 = math.rsqrt %148 : vector<16x1xf32>
    %150 = vector.broadcast %149 : vector<16x1xf32> to vector<16x32xf32>
    %151 = arith.mulf %141, %150 : vector<16x32xf32>
    %cst_49 = arith.constant dense<0.000000e+00> : vector<16x32xf32>
    %152 = tpu.matmul %151, %17, %cst_49 {dimension_numbers = #tpu.dot_dimension_numbers<[1], [0], [0], [1], [0, 0, 1, 1], [], []>} : vector<16x32xf32>, vector<32x32xf32>, vector<16x32xf32> -> vector<16x32xf32>
    %153 = arith.addf %152, %9 : vector<16x32xf32>
    %154 = vector.shape_cast %153 : vector<16x32xf32> to vector<2x8x32xf32>
    "tpu.trace_start"() <{level = 10 : i32, message = "bnd,bsd->bns"}> : () -> ()
    %cst_50 = arith.constant dense<0.000000e+00> : vector<2x16x8xf32>
    %155 = tpu.matmul %45, %154, %cst_50 {dimension_numbers = #tpu.dot_dimension_numbers<[2], [2], [1], [1], [0, 0, 0, 1, 1, 1], [0], [0]>} : vector<2x16x32xf32>, vector<2x8x32xf32>, vector<2x16x8xf32> -> vector<2x16x8xf32>
    "tpu.trace_stop"() : () -> ()
    %cst_51 = arith.constant dense<0xFF800000> : vector<2x16xf32>
    %156 = vector.multi_reduction <maximumf>, %155, %cst_51 [2] : vector<2x16x8xf32> to vector<2x16xf32>
    %157 = vector.shape_cast %156 : vector<2x16xf32> to vector<2x16x1xf32>
    %158 = vector.broadcast %157 : vector<2x16x1xf32> to vector<2x16x8xf32>
    %159 = arith.subf %155, %158 : vector<2x16x8xf32>
    %160 = math.exp %159 : vector<2x16x8xf32>
    %cst_52 = arith.constant dense<0.000000e+00> : vector<2x16xf32>
    %161 = vector.multi_reduction <add>, %160, %cst_52 [2] : vector<2x16x8xf32> to vector<2x16xf32>
    %162 = vector.shape_cast %161 : vector<2x16xf32> to vector<2x16x1xf32>
    %163 = tpu.reciprocal %162 {approx = true} : vector<2x16x1xf32> -> vector<2x16x1xf32>
    %164 = vector.broadcast %163 : vector<2x16x1xf32> to vector<2x16x8xf32>
    %165 = arith.mulf %160, %164 : vector<2x16x8xf32>
    %cst_53 = arith.constant 9.99999993E-9 : f32
    %166 = vector.broadcast %cst_53 : f32 to vector<2x16x8xf32>
    %167 = arith.addf %165, %166 : vector<2x16x8xf32>
    %cst_54 = arith.constant dense<0.000000e+00> : vector<2x8xf32>
    %168 = vector.multi_reduction <add>, %167, %cst_54 [1] : vector<2x16x8xf32> to vector<2x8xf32>
    %169 = vector.shape_cast %168 : vector<2x8xf32> to vector<2x1x8xf32>
    %170 = tpu.reciprocal %169 {approx = true} : vector<2x1x8xf32> -> vector<2x1x8xf32>
    %171 = vector.broadcast %170 : vector<2x1x8xf32> to vector<2x16x8xf32>
    %172 = arith.mulf %167, %171 : vector<2x16x8xf32>
    "tpu.trace_start"() <{level = 10 : i32, message = "bns,bnd->bsd"}> : () -> ()
    %cst_55 = arith.constant dense<0.000000e+00> : vector<2x8x32xf32>
    %173 = tpu.matmul %172, %47, %cst_55 {dimension_numbers = #tpu.dot_dimension_numbers<[1], [1], [2], [2], [0, 0, 0, 2, 1, 2], [0], [0]>} : vector<2x16x8xf32>, vector<2x16x32xf32>, vector<2x8x32xf32> -> vector<2x8x32xf32>
    "tpu.trace_stop"() : () -> ()
    %174 = vector.shape_cast %173 : vector<2x8x32xf32> to vector<16x32xf32>
    %175 = tpu.concatenate %174, %135 in 1 : vector<16x32xf32>, vector<16x32xf32> -> vector<16x64xf32>
    %cst_56 = arith.constant dense<0.000000e+00> : vector<16x128xf32>
    %176 = tpu.matmul %175, %18, %cst_56 {dimension_numbers = #tpu.dot_dimension_numbers<[1], [0], [0], [1], [0, 0, 1, 1], [], []>} : vector<16x64xf32>, vector<64x128xf32>, vector<16x128xf32> -> vector<16x128xf32>
    %177 = arith.addf %176, %11 : vector<16x128xf32>
    %178 = vector.extract_strided_slice %177 {offsets = [0, 0], sizes = [16, 64], strides = [1, 1]} : vector<16x128xf32> to vector<16x64xf32>
    %179 = arith.negf %178 : vector<16x64xf32>
    %180 = math.exp %179 : vector<16x64xf32>
    %cst_57 = arith.constant 1.000000e+00 : f32
    %181 = vector.broadcast %cst_57 : f32 to vector<16x64xf32>
    %182 = arith.addf %181, %180 : vector<16x64xf32>
    %183 = arith.divf %181, %182 : vector<16x64xf32>
    %184 = vector.extract_strided_slice %183 {offsets = [0, 0], sizes = [16, 32], strides = [1, 1]} : vector<16x64xf32> to vector<16x32xf32>
    %185 = vector.extract_strided_slice %183 {offsets = [0, 32], sizes = [16, 32], strides = [1, 1]} : vector<16x64xf32> to vector<16x32xf32>
    %186 = vector.extract_strided_slice %177 {offsets = [0, 64], sizes = [16, 32], strides = [1, 1]} : vector<16x128xf32> to vector<16x32xf32>
    %187 = vector.extract_strided_slice %177 {offsets = [0, 96], sizes = [16, 32], strides = [1, 1]} : vector<16x128xf32> to vector<16x32xf32>
    %188 = arith.mulf %184, %187 : vector<16x32xf32>
    %189 = arith.addf %186, %188 : vector<16x32xf32>
    %190 = math.tanh %189 : vector<16x32xf32>
    %cst_58 = arith.constant 1.000000e+00 : f32
    %191 = vector.broadcast %cst_58 : f32 to vector<16x32xf32>
    %192 = arith.subf %191, %185 : vector<16x32xf32>
    %193 = arith.mulf %192, %190 : vector<16x32xf32>
    %194 = arith.mulf %185, %135 : vector<16x32xf32>
    %195 = arith.addf %193, %194 : vector<16x32xf32>
    %cst_59 = arith.constant dense<0.000000e+00> : vector<16xf32>
    %196 = vector.multi_reduction <add>, %195, %cst_59 [1] : vector<16x32xf32> to vector<16xf32>
    %197 = vector.shape_cast %196 : vector<16xf32> to vector<16x1xf32>
    %cst_60 = arith.constant 3.200000e+01 : f32
    %198 = vector.broadcast %cst_60 : f32 to vector<16x1xf32>
    %199 = arith.divf %197, %198 : vector<16x1xf32>
    %200 = vector.broadcast %199 : vector<16x1xf32> to vector<16x32xf32>
    %201 = arith.subf %195, %200 : vector<16x32xf32>
    %202 = arith.mulf %201, %201 : vector<16x32xf32>
    %cst_61 = arith.constant dense<0.000000e+00> : vector<16xf32>
    %203 = vector.multi_reduction <add>, %202, %cst_61 [1] : vector<16x32xf32> to vector<16xf32>
    %204 = vector.shape_cast %203 : vector<16xf32> to vector<16x1xf32>
    %cst_62 = arith.constant 3.200000e+01 : f32
    %205 = vector.broadcast %cst_62 : f32 to vector<16x1xf32>
    %206 = arith.divf %204, %205 : vector<16x1xf32>
    %cst_63 = arith.constant 9.99999974E-6 : f32
    %207 = vector.broadcast %cst_63 : f32 to vector<16x1xf32>
    %208 = arith.addf %206, %207 : vector<16x1xf32>
    %209 = math.rsqrt %208 : vector<16x1xf32>
    %210 = vector.broadcast %209 : vector<16x1xf32> to vector<16x32xf32>
    %211 = arith.mulf %201, %210 : vector<16x32xf32>
    %cst_64 = arith.constant dense<0.000000e+00> : vector<16x64xf32>
    %212 = tpu.matmul %211, %19, %cst_64 {dimension_numbers = #tpu.dot_dimension_numbers<[1], [0], [0], [1], [0, 0, 1, 1], [], []>} : vector<16x32xf32>, vector<32x64xf32>, vector<16x64xf32> -> vector<16x64xf32>
    %213 = arith.addf %212, %13 : vector<16x64xf32>
    %cst_65 = arith.constant 0.000000e+00 : f32
    %214 = vector.broadcast %cst_65 : f32 to vector<16x64xf32>
    %215 = arith.maximumf %213, %214 : vector<16x64xf32>
    %cst_66 = arith.constant dense<0.000000e+00> : vector<16x32xf32>
    %216 = tpu.matmul %215, %20, %cst_66 {dimension_numbers = #tpu.dot_dimension_numbers<[1], [0], [0], [1], [0, 0, 1, 1], [], []>} : vector<16x64xf32>, vector<64x32xf32>, vector<16x32xf32> -> vector<16x32xf32>
    %217 = arith.addf %195, %216 : vector<16x32xf32>
    %218 = arith.addf %217, %15 : vector<16x32xf32>
    %cst_67 = arith.constant dense<0.000000e+00> : vector<16xf32>
    %219 = vector.multi_reduction <add>, %218, %cst_67 [1] : vector<16x32xf32> to vector<16xf32>
    %220 = vector.shape_cast %219 : vector<16xf32> to vector<16x1xf32>
    %cst_68 = arith.constant 3.200000e+01 : f32
    %221 = vector.broadcast %cst_68 : f32 to vector<16x1xf32>
    %222 = arith.divf %220, %221 : vector<16x1xf32>
    %223 = vector.broadcast %222 : vector<16x1xf32> to vector<16x32xf32>
    %224 = arith.subf %218, %223 : vector<16x32xf32>
    %225 = arith.mulf %224, %224 : vector<16x32xf32>
    %cst_69 = arith.constant dense<0.000000e+00> : vector<16xf32>
    %226 = vector.multi_reduction <add>, %225, %cst_69 [1] : vector<16x32xf32> to vector<16xf32>
    %227 = vector.shape_cast %226 : vector<16xf32> to vector<16x1xf32>
    %cst_70 = arith.constant 3.200000e+01 : f32
    %228 = vector.broadcast %cst_70 : f32 to vector<16x1xf32>
    %229 = arith.divf %227, %228 : vector<16x1xf32>
    %cst_71 = arith.constant 9.99999974E-6 : f32
    %230 = vector.broadcast %cst_71 : f32 to vector<16x1xf32>
    %231 = arith.addf %229, %230 : vector<16x1xf32>
    %232 = math.rsqrt %231 : vector<16x1xf32>
    %233 = vector.broadcast %232 : vector<16x1xf32> to vector<16x32xf32>
    %234 = arith.mulf %224, %233 : vector<16x32xf32>
    %cst_72 = arith.constant dense<0.000000e+00> : vector<16x32xf32>
    %235 = tpu.matmul %234, %17, %cst_72 {dimension_numbers = #tpu.dot_dimension_numbers<[1], [0], [0], [1], [0, 0, 1, 1], [], []>} : vector<16x32xf32>, vector<32x32xf32>, vector<16x32xf32> -> vector<16x32xf32>
    %236 = arith.addf %235, %9 : vector<16x32xf32>
    %237 = vector.shape_cast %236 : vector<16x32xf32> to vector<2x8x32xf32>
    "tpu.trace_start"() <{level = 10 : i32, message = "bnd,bsd->bns"}> : () -> ()
    %cst_73 = arith.constant dense<0.000000e+00> : vector<2x16x8xf32>
    %238 = tpu.matmul %45, %237, %cst_73 {dimension_numbers = #tpu.dot_dimension_numbers<[2], [2], [1], [1], [0, 0, 0, 1, 1, 1], [0], [0]>} : vector<2x16x32xf32>, vector<2x8x32xf32>, vector<2x16x8xf32> -> vector<2x16x8xf32>
    "tpu.trace_stop"() : () -> ()
    %cst_74 = arith.constant dense<0xFF800000> : vector<2x16xf32>
    %239 = vector.multi_reduction <maximumf>, %238, %cst_74 [2] : vector<2x16x8xf32> to vector<2x16xf32>
    %240 = vector.shape_cast %239 : vector<2x16xf32> to vector<2x16x1xf32>
    %241 = vector.broadcast %240 : vector<2x16x1xf32> to vector<2x16x8xf32>
    %242 = arith.subf %238, %241 : vector<2x16x8xf32>
    %243 = math.exp %242 : vector<2x16x8xf32>
    %cst_75 = arith.constant dense<0.000000e+00> : vector<2x16xf32>
    %244 = vector.multi_reduction <add>, %243, %cst_75 [2] : vector<2x16x8xf32> to vector<2x16xf32>
    %245 = vector.shape_cast %244 : vector<2x16xf32> to vector<2x16x1xf32>
    %246 = tpu.reciprocal %245 {approx = true} : vector<2x16x1xf32> -> vector<2x16x1xf32>
    %247 = vector.broadcast %246 : vector<2x16x1xf32> to vector<2x16x8xf32>
    %248 = arith.mulf %243, %247 : vector<2x16x8xf32>
    %cst_76 = arith.constant 9.99999993E-9 : f32
    %249 = vector.broadcast %cst_76 : f32 to vector<2x16x8xf32>
    %250 = arith.addf %248, %249 : vector<2x16x8xf32>
    %cst_77 = arith.constant dense<0.000000e+00> : vector<2x8xf32>
    %251 = vector.multi_reduction <add>, %250, %cst_77 [1] : vector<2x16x8xf32> to vector<2x8xf32>
    %252 = vector.shape_cast %251 : vector<2x8xf32> to vector<2x1x8xf32>
    %253 = tpu.reciprocal %252 {approx = true} : vector<2x1x8xf32> -> vector<2x1x8xf32>
    %254 = vector.broadcast %253 : vector<2x1x8xf32> to vector<2x16x8xf32>
    %255 = arith.mulf %250, %254 : vector<2x16x8xf32>
    "tpu.trace_start"() <{level = 10 : i32, message = "bns,bnd->bsd"}> : () -> ()
    %cst_78 = arith.constant dense<0.000000e+00> : vector<2x8x32xf32>
    %256 = tpu.matmul %255, %47, %cst_78 {dimension_numbers = #tpu.dot_dimension_numbers<[1], [1], [2], [2], [0, 0, 0, 2, 1, 2], [0], [0]>} : vector<2x16x8xf32>, vector<2x16x32xf32>, vector<2x8x32xf32> -> vector<2x8x32xf32>
    "tpu.trace_stop"() : () -> ()
    %257 = vector.shape_cast %256 : vector<2x8x32xf32> to vector<16x32xf32>
    %258 = tpu.concatenate %257, %218 in 1 : vector<16x32xf32>, vector<16x32xf32> -> vector<16x64xf32>
    %cst_79 = arith.constant dense<0.000000e+00> : vector<16x128xf32>
    %259 = tpu.matmul %258, %18, %cst_79 {dimension_numbers = #tpu.dot_dimension_numbers<[1], [0], [0], [1], [0, 0, 1, 1], [], []>} : vector<16x64xf32>, vector<64x128xf32>, vector<16x128xf32> -> vector<16x128xf32>
    %260 = arith.addf %259, %11 : vector<16x128xf32>
    %261 = vector.extract_strided_slice %260 {offsets = [0, 0], sizes = [16, 64], strides = [1, 1]} : vector<16x128xf32> to vector<16x64xf32>
    %262 = arith.negf %261 : vector<16x64xf32>
    %263 = math.exp %262 : vector<16x64xf32>
    %cst_80 = arith.constant 1.000000e+00 : f32
    %264 = vector.broadcast %cst_80 : f32 to vector<16x64xf32>
    %265 = arith.addf %264, %263 : vector<16x64xf32>
    %266 = arith.divf %264, %265 : vector<16x64xf32>
    %267 = vector.extract_strided_slice %266 {offsets = [0, 0], sizes = [16, 32], strides = [1, 1]} : vector<16x64xf32> to vector<16x32xf32>
    %268 = vector.extract_strided_slice %266 {offsets = [0, 32], sizes = [16, 32], strides = [1, 1]} : vector<16x64xf32> to vector<16x32xf32>
    %269 = vector.extract_strided_slice %260 {offsets = [0, 64], sizes = [16, 32], strides = [1, 1]} : vector<16x128xf32> to vector<16x32xf32>
    %270 = vector.extract_strided_slice %260 {offsets = [0, 96], sizes = [16, 32], strides = [1, 1]} : vector<16x128xf32> to vector<16x32xf32>
    %271 = arith.mulf %267, %270 : vector<16x32xf32>
    %272 = arith.addf %269, %271 : vector<16x32xf32>
    %273 = math.tanh %272 : vector<16x32xf32>
    %cst_81 = arith.constant 1.000000e+00 : f32
    %274 = vector.broadcast %cst_81 : f32 to vector<16x32xf32>
    %275 = arith.subf %274, %268 : vector<16x32xf32>
    %276 = arith.mulf %275, %273 : vector<16x32xf32>
    %277 = arith.mulf %268, %218 : vector<16x32xf32>
    %278 = arith.addf %276, %277 : vector<16x32xf32>
    %cst_82 = arith.constant dense<0.000000e+00> : vector<16xf32>
    %279 = vector.multi_reduction <add>, %278, %cst_82 [1] : vector<16x32xf32> to vector<16xf32>
    %280 = vector.shape_cast %279 : vector<16xf32> to vector<16x1xf32>
    %cst_83 = arith.constant 3.200000e+01 : f32
    %281 = vector.broadcast %cst_83 : f32 to vector<16x1xf32>
    %282 = arith.divf %280, %281 : vector<16x1xf32>
    %283 = vector.broadcast %282 : vector<16x1xf32> to vector<16x32xf32>
    %284 = arith.subf %278, %283 : vector<16x32xf32>
    %285 = arith.mulf %284, %284 : vector<16x32xf32>
    %cst_84 = arith.constant dense<0.000000e+00> : vector<16xf32>
    %286 = vector.multi_reduction <add>, %285, %cst_84 [1] : vector<16x32xf32> to vector<16xf32>
    %287 = vector.shape_cast %286 : vector<16xf32> to vector<16x1xf32>
    %cst_85 = arith.constant 3.200000e+01 : f32
    %288 = vector.broadcast %cst_85 : f32 to vector<16x1xf32>
    %289 = arith.divf %287, %288 : vector<16x1xf32>
    %cst_86 = arith.constant 9.99999974E-6 : f32
    %290 = vector.broadcast %cst_86 : f32 to vector<16x1xf32>
    %291 = arith.addf %289, %290 : vector<16x1xf32>
    %292 = math.rsqrt %291 : vector<16x1xf32>
    %293 = vector.broadcast %292 : vector<16x1xf32> to vector<16x32xf32>
    %294 = arith.mulf %284, %293 : vector<16x32xf32>
    %cst_87 = arith.constant dense<0.000000e+00> : vector<16x64xf32>
    %295 = tpu.matmul %294, %19, %cst_87 {dimension_numbers = #tpu.dot_dimension_numbers<[1], [0], [0], [1], [0, 0, 1, 1], [], []>} : vector<16x32xf32>, vector<32x64xf32>, vector<16x64xf32> -> vector<16x64xf32>
    %296 = arith.addf %295, %13 : vector<16x64xf32>
    %cst_88 = arith.constant 0.000000e+00 : f32
    %297 = vector.broadcast %cst_88 : f32 to vector<16x64xf32>
    %298 = arith.maximumf %296, %297 : vector<16x64xf32>
    %cst_89 = arith.constant dense<0.000000e+00> : vector<16x32xf32>
    %299 = tpu.matmul %298, %20, %cst_89 {dimension_numbers = #tpu.dot_dimension_numbers<[1], [0], [0], [1], [0, 0, 1, 1], [], []>} : vector<16x64xf32>, vector<64x32xf32>, vector<16x32xf32> -> vector<16x32xf32>
    %300 = arith.addf %278, %299 : vector<16x32xf32>
    %301 = arith.addf %300, %15 : vector<16x32xf32>
    %c0_90 = arith.constant 0 : index
    %c0_91 = arith.constant 0 : index
    %302 = vector.load %arg9[%c0_90, %c0_91] : memref<16x32xf32, #tpu.memory_space<vmem>>, vector<16x32xf32>
    tpu.vector_store %arg9[%c0_90, %c0_91], %301 {strides = array<i32>} : memref<16x32xf32, #tpu.memory_space<vmem>>, vector<16x32xf32>,
    return
  }
  func.func @transform_0(%arg0: i32) -> (i32, i32) {
    %c0_i32 = arith.constant 0 : i32
    %c0_i32_0 = arith.constant 0 : i32
    return %arg0, %c0_i32 : i32, i32
  }
  func.func @transform_1(%arg0: i32) -> (i32, i32) {
    %c0_i32 = arith.constant 0 : i32
    %c0_i32_0 = arith.constant 0 : i32
    return %arg0, %c0_i32 : i32, i32
  }
  func.func @transform_2(%arg0: i32) -> (i32, i32) {
    %c0_i32 = arith.constant 0 : i32
    %c0_i32_0 = arith.constant 0 : i32
    %c0_i32_1 = arith.constant 0 : i32
    return %c0_i32, %c0_i32_0 : i32, i32
  }
  func.func @transform_3(%arg0: i32) -> (i32, i32) {
    %c0_i32 = arith.constant 0 : i32
    %c0_i32_0 = arith.constant 0 : i32
    %c0_i32_1 = arith.constant 0 : i32
    return %c0_i32, %c0_i32_0 : i32, i32
  }
  func.func @transform_4(%arg0: i32) -> (i32, i32) {
    %c0_i32 = arith.constant 0 : i32
    %c0_i32_0 = arith.constant 0 : i32
    %c0_i32_1 = arith.constant 0 : i32
    return %c0_i32, %c0_i32_0 : i32, i32
  }
  func.func @transform_5(%arg0: i32) -> (i32, i32) {
    %c0_i32 = arith.constant 0 : i32
    %c0_i32_0 = arith.constant 0 : i32
    %c0_i32_1 = arith.constant 0 : i32
    return %c0_i32, %c0_i32_0 : i32, i32
  }
  func.func @transform_6(%arg0: i32) -> (i32, i32) {
    %c0_i32 = arith.constant 0 : i32
    %c0_i32_0 = arith.constant 0 : i32
    %c0_i32_1 = arith.constant 0 : i32
    return %c0_i32, %c0_i32_0 : i32, i32
  }
  func.func @transform_7(%arg0: i32) -> (i32, i32) {
    %c0_i32 = arith.constant 0 : i32
    %c0_i32_0 = arith.constant 0 : i32
    %c0_i32_1 = arith.constant 0 : i32
    return %c0_i32, %c0_i32_0 : i32, i32
  }
  func.func @transform_8(%arg0: i32) -> (i32, i32) {
    %c0_i32 = arith.constant 0 : i32
    %c0_i32_0 = arith.constant 0 : i32
    return %arg0, %c0_i32 : i32, i32
  }
}

</mosaic_0001>

<bundles_post_ra>
// kernel: tpu_custom_call.1
= control target key start
LH: loop header
LB: loop body
LE: loop exit
PB: predicated region body
PF: predicated region fallthrough
CT: control target
= control target key end

     0   :  { %13 = vsyncpa [#allocation3], 0  ;;  %s4615_s0 = inlined_call_operand.vmem [shape: f32[32,32], index: 0, kind: input, shape index: {}]   ;;  %s4616_s1 = inlined_call_operand.hbm [shape: f32[16,32], index: 1, kind: input, shape index: {}]   ;;  %s4617_s2 = inlined_call_operand.vmem [shape: f32[8,128], index: 2, kind: input, shape index: {}]   ;;  %s4618_s3 = inlined_call_operand.hbm [shape: f32[32,64], index: 3, kind: input, shape index: {}]   ;;  %s4619_s4 = inlined_call_operand.hbm [shape: f32[32,32], index: 4, kind: input, shape index: {}]   ;;  %s4620_s5 = inlined_call_operand.vmem [shape: f32[64,128], index: 5, kind: input, shape index: {}]   ;;  %s4621_s6 = inlined_call_operand.hbm [shape: f32[32,64], index: 6, kind: input, shape index: {}]   ;;  %s4622_s7 = inlined_call_operand.vmem [shape: f32[64,32], index: 7, kind: input, shape index: {}]   ;;  %s4623_s8 = inlined_call_operand.hbm [shape: f32[16,32], index: 8, kind: output, shape index: {}]  }
   0x1   :  { %14 = vsyncpa [#allocation6], 0 }
   0x2   :  { %15 = vsyncpa [#allocation9], 0 }
   0x3   :  { %16 = vsyncpa [#allocation4], 0  ;;  %s3855_s27 = smov [#allocation5]   ;;  %s3856_s29 = smov [#allocation2]  }
   0x4   :  { %s38_s28 = sshll.u32 %s3855_s27, 4  ;;  %s24_s30 = sshll.u32 %s3856_s29, 4  ;;  %s39_s28 = int_to_ptr.vmem [resolvable:$true] %s38_s28  ;;  %s25_s30 = int_to_ptr.vmem [resolvable:$true] %s24_s30 }
   0x5   :  { %s3755_s9 = scalar_lea.vmem %s39_s28, 512  ;;  %p3760_p1 = scmp.lt.s32.totalorder %s39_s28, %s39_s28 }
   0x6   :  { %p3756_p0 = scmp.ne.s32.totalorder %s39_s28, %s3755_s9  ;;  %p3761_p2 = scmp.lt.s32.totalorder %s3755_s9, %s3755_s9 }
   0x8   :  { %p3762_p3 = por %p3761_p2, %p3760_p1 }
   0xa   :  { %p3763_p4 = pnand %p3762_p3, %p3756_p0 }
   0xc   :  { %3766 = shalt.err (!%p3763_p4)
}
   0xd   :  { %s3857_s10 = smov 128   ;;  %s3858_s11 = smov 8  }
   0xe   :  { %44 = dma.hbm_to_vmem [thread:$0]  %s4618_s3, 512, %s39_s28, [#allocation6], %s3857_s10, %s3857_s10, %s3858_s11  }
   0xf   :  { %s3775_s14 = scalar_lea.vmem %s25_s30, 256  ;;  %p3780_p6 = scmp.lt.s32.totalorder %s25_s30, %s25_s30 }
  0x10   :  { %p3776_p5 = scmp.ne.s32.totalorder %s25_s30, %s3775_s14  ;;  %p3781_p7 = scmp.lt.s32.totalorder %s3775_s14, %s3775_s14 }
  0x12   :  { %p3782_p8 = por %p3781_p7, %p3780_p6 }
  0x14   :  { %p3783_p9 = pnand %p3782_p8, %p3776_p5 }
  0x16   :  { %3786 = shalt.err (!%p3783_p9)
}
  0x17   :  { %30 = dma.hbm_to_vmem [thread:$0]  %s4616_s1, 256, %s25_s30, [#allocation3], %s3857_s10, %s3857_s10, %s3858_s11  }
  0x18   :  { %s3859_s17 = smov [#allocation7]   ;;  %s3860_s19 = smov [#allocation8]  }
  0x19   :  { %s50_s18 = sshll.u32 %s3859_s17, 4  ;;  %s64_s20 = sshll.u32 %s3860_s19, 4  ;;  %s51_s18 = int_to_ptr.vmem [resolvable:$true] %s50_s18  ;;  %s65_s20 = int_to_ptr.vmem [resolvable:$true] %s64_s20 }
  0x1a   :  { %s3795_s3 = scalar_lea.vmem %s51_s18, 512  ;;  %p3800_p11 = scmp.lt.s32.totalorder %s51_s18, %s51_s18 }
  0x1b   :  { %p3796_p10 = scmp.ne.s32.totalorder %s51_s18, %s3795_s3  ;;  %p3801_p12 = scmp.lt.s32.totalorder %s3795_s3, %s3795_s3 }
  0x1d   :  { %p3802_p13 = por %p3801_p12, %p3800_p11 }
  0x1f   :  { %p3803_p0 = pnand %p3802_p13, %p3796_p10 }
  0x21   :  { %3806 = shalt.err (!%p3803_p0)
}
  0x22   :  { %56 = dma.hbm_to_vmem [thread:$0]  %s4619_s4, 512, %s51_s18, [#allocation6], %s3857_s10, %s3857_s10, %s3858_s11  }
  0x23   :  { %s3815_s1 = scalar_lea.vmem %s65_s20, 512  ;;  %p3820_p2 = scmp.lt.s32.totalorder %s65_s20, %s65_s20 }
  0x24   :  { %p3816_p1 = scmp.ne.s32.totalorder %s65_s20, %s3815_s1  ;;  %p3821_p3 = scmp.lt.s32.totalorder %s3815_s1, %s3815_s1 }
  0x26   :  { %p3822_p4 = por %p3821_p3, %p3820_p2 }
  0x28   :  { %p3823_p5 = pnand %p3822_p4, %p3816_p1 }
  0x2a   :  { %3826 = shalt.err (!%p3823_p5)
}
  0x2b   :  { %70 = dma.hbm_to_vmem [thread:$0]  %s4621_s6, 512, %s65_s20, [#allocation9], %s3857_s10, %s3857_s10, %s3858_s11  }
  0x2c   :  { %3847 = dma.done.wait [#allocation3], 256  }
  0x2d   :  { %3848 = vsyncadd [#allocation3], 4294967040 }
  0x2e   :  { %3849 = dma.done.wait [#allocation6], 1024  }
  0x2f   :  { %3850 = vsyncadd [#allocation6], 4294966272 }
  0x30   :  { %3851 = dma.done.wait [#allocation9], 512  }
  0x31   :  { %3852 = vsyncadd [#allocation9], 4294966784  ;;  %v86_v0 = vlaneseq  ;;  %vm134_vm0 = vcmask 261120   ;;  %v130_v4 = vld [vmem:[%s4615_s0] sm:$0xff]  ;;  %v132_v5 = vld [vmem:[%s4615_s0 + $0x10] sm:$0xff]  ;;  %vm582_vm1 = vcmask 64512  }
  0x32   :  { %v131_v6 = vld [vmem:[%s4615_s0 + $0x8] sm:$0xff]  ;;  %v135_v7 = vsel %vm134_vm0, %v130_v4, 0.0  ;;  %v141_v8 = vsel %vm134_vm0, %v132_v5, 0.0  ;;  %v133_v9 = vld [vmem:[%s4615_s0 + $0x18] sm:$0xff]  ;;  %v3957_v10 = vld [vmem:[%s4617_s2] sm:$0xff]  ;;  %s3862_s0 = smov 96  }
  0x33   :  { %v3936_v1 = vshrl.u32 %v86_v0, 7  ;;  %v293_v11 = vld [vmem:[#allocation2] sm:$0xff]  ;;  %136 = vadd.xlane.f32.xlu0 %v135_v7  ;;  %142 = vadd.xlane.f32.xlu1 %v141_v8  ;;  %v294_v14 = vld [vmem:[#allocation2 + $0x8] sm:$0xff]  ;;  %v138_v15 = vsel %vm134_vm0, %v131_v6, 0.0  ;;  %v144_v16 = vsel %vm134_vm0, %v133_v9, 0.0  ;;  %v103_v55 = vld [vmem:[#allocation5 + $0x8] sm:$0xff] }
  0x34   :  { %v105_v53 = vld [vmem:[#allocation5 + $0x18] sm:$0xff]  ;;  %v104_v54 = vld [vmem:[#allocation5 + $0x10] sm:$0xff]  ;;  %v102_v56 = vld [vmem:[#allocation5] sm:$0xff]  ;;  %vm3863_vm2 = vmmov 0   ;;  %s3864_s14 = smov 32   ;;  %vm695_vm3 = vcmask 130048  }
  0x35   :  { %v297_v2 = vsub.s32 6, %v3936_v1  ;;  %v303_v3 = vsub.s32 5, %v3936_v1  ;;  %3317 = vmatprep.subr.mxu1 %v105_v53  ;;  %v4003_v57 = vld [vmem:[#allocation7 + $0x18] sm:$0xff]  ;;  %vm892_vm4 = vcmask 523264   ;;  %s3865_s26 = smov 64  }
  0x36   :  { %3318 = vmatpush3.msra.mxu1 %v105_v53 }
  0x37   :  { %v298_v12 = vrot.slane %v3957_v10, %v297_v2  ;;  %v304_v13 = vrot.slane %v3957_v10, %v303_v3  ;;  %139 = vadd.xlane.f32.xlu0 %v138_v15  ;;  %145 = vadd.xlane.f32.xlu1 %v144_v16 }
  0x38   :  { %3319 = vmatprep.subr.mxu1 %v104_v54 }
  0x39   :  { %v299_v17 = vmul.f32 %v298_v12, %v293_v11  ;;  %v300_v18 = vmul.f32 %v298_v12, %v294_v14  ;;  %3320 = vmatpush3.msra.mxu1 %v104_v54 }
  0x3a   :  { %3321 = vmatprep.subr.mxu1 %v103_v55 }
  0x3b   :  { %v3963_v19 = vadd.f32 %v304_v13, %v299_v17  ;;  %v3965_v20 = vadd.f32 %v304_v13, %v300_v18  ;;  %3322 = vmatpush3.msra.mxu1 %v103_v55 }
  0x3c   :  { %3323 = vmatprep.subr.mxu1 %v102_v56 }
  0x3d   :  { %v307_v21 = vsel %vm134_vm0, %v3963_v19, 0.0  ;;  %v310_v22 = vsel %vm134_vm0, %v3965_v20, 0.0  ;;  %3324 = vmatpush3.msra.mxu1 %v102_v56 }
  0x3e   :  { %308 = vadd.xlane.f32.xlu0 %v307_v21  ;;  %311 = vadd.xlane.f32.xlu1 %v310_v22  ;;  %v4010_v22 = vld [vmem:[#allocation7 + $0x10] sm:$0xff] }
  0x3f   :  { %3331 = vmatprep.subr.mxu1 %v4003_v57 }
  0xbc   :  { %v137_v23 = vpop.xlane.xlu0 %136  ;;  %v143_v24 = vpop.xlane.xlu1 %142 }
  0xbd   :  { %v148_v25 = vmul.f32 0.03125, %v137_v23  ;;  %v150_v26 = vmul.f32 0.03125, %v143_v24  ;;  %v4015_v24 = vld [vmem:[#allocation7 + $0x8] sm:$0xff] }
  0xbf   :  { %v3971_v27 = vsub.f32 %v130_v4, %v148_v25  ;;  %v3973_v28 = vsub.f32 %v132_v5, %v150_v26 }
  0xc0   :  { %v140_v29 = vpop.xlane.xlu0 %139  ;;  %v146_v30 = vpop.xlane.xlu1 %145 }
  0xc1   :  { %v149_v31 = vmul.f32 0.03125, %v140_v29  ;;  %v151_v32 = vmul.f32 0.03125, %v146_v30  ;;  %v156_v33 = vmul.f32 %v3971_v27, %v3971_v27  ;;  %v158_v34 = vmul.f32 %v3973_v28, %v3973_v28 }
  0xc3   :  { %v3979_v35 = vsub.f32 %v131_v6, %v149_v31  ;;  %v3981_v36 = vsub.f32 %v133_v9, %v151_v32  ;;  %v160_v37 = vsel %vm134_vm0, %v156_v33, 0.0  ;;  %v166_v40 = vsel %vm134_vm0, %v158_v34, 0.0 }
  0xc4   :  { %161 = vadd.xlane.f32.xlu0 %v160_v37  ;;  %v190_v31 = vsub.s32 0, %v3936_v1 }
  0xc5   :  { %v157_v42 = vmul.f32 %v3979_v35, %v3979_v35  ;;  %v159_v44 = vmul.f32 %v3981_v36, %v3981_v36 }
  0xc6   :  { %v191_v33 = vrot.slane %v3957_v10, %v190_v31 }
  0xc7   :  { %v309_v38 = vpop.xlane.xlu0 %308  ;;  %v312_v39 = vpop.xlane.xlu1 %311  ;;  %v163_v46 = vsel %vm134_vm0, %v157_v42, 0.0  ;;  %v169_v48 = vsel %vm134_vm0, %v159_v44, 0.0 }
  0xc8   :  { %v313_v41 = vmul.f32 0.03125, %v309_v38  ;;  %v314_v43 = vmul.f32 0.03125, %v312_v39  ;;  %164 = vadd.xlane.f32.xlu1 %v163_v46  ;;  %167 = vadd.xlane.f32.xlu0 %v166_v40  ;;  %v88_v38 = vsub.s32 1, %v3936_v1 }
  0xca   :  { %v3990_v45 = vsub.f32 %v3963_v19, %v313_v41  ;;  %v3994_v47 = vsub.f32 %v3965_v20, %v314_v43  ;;  %v4042_v41 = vrot.slane %v3957_v10, %v88_v38 }
  0xcc   :  { %v317_v49 = vmul.f32 %v3990_v45, %v3990_v45  ;;  %v318_v50 = vmul.f32 %v3994_v47, %v3994_v47  ;;  %170 = vadd.xlane.f32.xlu1 %v169_v48 }
  0xce   :  { %v319_v51 = vsel %vm134_vm0, %v317_v49, 0.0  ;;  %v322_v52 = vsel %vm134_vm0, %v318_v50, 0.0 }
  0xcf   :  { %320 = vadd.xlane.f32.xlu0 %v319_v51 }
  0xd0   :  { %323 = vadd.xlane.f32.xlu1 %v322_v52 }
 0x14d   :  { %v162_v58 = vpop.xlane.xlu0 %161 }
 0x14e   :  { %v172_v59 = vmul.f32 0.03125, %v162_v58 }
 0x150   :  { %v176_v60 = vadd.f32 1e-05, %v172_v59 }
 0x151   :  { %v165_v61 = vpop.xlane.xlu1 %164  ;;  %v168_v62 = vpop.xlane.xlu0 %167 }
 0x152   :  { %3595 = vrsqrt.f32 %v176_v60  ;;  %v173_v63 = vmul.f32 0.03125, %v165_v61  ;;  %v174_v0 = vmul.f32 0.03125, %v168_v62 }
 0x154   :  { %v177_v2 = vadd.f32 1e-05, %v173_v63  ;;  %v178_v3 = vadd.f32 1e-05, %v174_v0 }
 0x155   :  { %v171_v4 = vpop.xlane.xlu1 %170 }
 0x156   :  { %3597 = vrsqrt.f32 %v177_v2  ;;  %v175_v6 = vmul.f32 0.03125, %v171_v4 }
 0x157   :  { %3599 = vrsqrt.f32 %v178_v3 }
 0x158   :  { %v321_v5 = vpop.xlane.xlu0 %320  ;;  %v179_v8 = vadd.f32 1e-05, %v175_v6 }
 0x159   :  { %v325_v7 = vmul.f32 0.03125, %v321_v5  ;;  %v324_v11 = vpop.xlane.xlu1 %323 }
 0x15a   :  { %3601 = vrsqrt.f32 %v179_v8  ;;  %v326_v12 = vmul.f32 0.03125, %v324_v11 }
 0x15b   :  { %v327_v9 = vadd.f32 1e-05, %v325_v7 }
 0x15c   :  { %v328_v13 = vadd.f32 1e-05, %v326_v12 }
 0x15d   :  { %3603 = vrsqrt.f32 %v327_v9 }
 0x15e   :  { %3605 = vrsqrt.f32 %v328_v13 }
 0x15f   :  { %v3596_v14 = vpop.eup %3595 }
 0x160   :  { %v184_v15 = vmul.f32 %v3596_v14, %v3971_v27 }
 0x162   :  { %3325 = vmatprep.mubr.msk.f32.mxu1 %vm134_vm0, %v184_v15 }
 0x163   :  { %v3598_v16 = vpop.eup %3597 }
 0x164   :  { %v3600_v17 = vpop.eup %3599  ;;  %v185_v18 = vmul.f32 %v3598_v16, %v3979_v35 }
 0x165   :  { %v186_v21 = vmul.f32 %v3600_v17, %v3973_v28  ;;  %v4021_v28 = vld [vmem:[#allocation7] sm:$0xff] }
 0x166   :  { %3326 = vmatmul.mubr.msk.f32.vlgmr.msra.gmra.mxu1 %vm134_vm0, %v185_v18  ;;  %v3861_v18 = vmov 0.0  }
 0x167   :  { %v3602_v23 = vpop.eup %3601  ;;  %3328 = vmatprep.mubr.msk.f32.mxu1 %vm134_vm0, %v186_v21  ;;  %3332 = vmatpush3.msra.mxu1 %v4003_v57 }
 0x168   :  { %3333 = vmatprep.subr.mxu1 %v4010_v22  ;;  %v187_v26 = vmul.f32 %v3602_v23, %v3981_v36 }
 0x169   :  { %3334 = vmatpush3.msra.mxu1 %v4010_v22 }
 0x16a   :  { %v3604_v25 = vpop.eup %3603  ;;  %3329 = vmatmul.mubr.msk.f32.gmra.mxu1 %vm134_vm0, %v187_v26  ;;  %3335 = vmatprep.subr.mxu1 %v4015_v24 }
 0x16b   :  { %v331_v27 = vmul.f32 %v3604_v25, %v3990_v45  ;;  %v3606_v29 = vpop.eup %3605  ;;  %3336 = vmatpush3.msra.mxu1 %v4015_v24 }
 0x16c   :  { %v332_v30 = vmul.f32 %v3606_v29, %v3994_v47  ;;  %3337 = vmatprep.subr.mxu1 %v4021_v28 }
 0x16d   :  { %3339 = vmatprep.mubr.msk.f32.mxu1 %vm134_vm0, %v331_v27  ;;  %3338 = vmatpush3.msra.mxu1 %v4021_v28 }
 0x16e   :  { %3340 = vmatmul.mubr.msk.f32.vlgmr.msra.gmra.mxu1 %vm134_vm0, %v332_v30  ;;  %3352 = vmatprep.subr.mxu1 %v3861_v18 }
 0x16f   :  { %3356 = vmatprep.mubr.msk.f32.mxu1 %vm3863_vm2, %v3861_v18 }
 0x226   :  { %v3327_v32 = vpop.f32.mrf.mxu1 }
 0x227   :  { %v276_v43 = vadd.f32 %v3327_v32, %v191_v33 }
 0x228   :  { %v270_v34 = vpop.f32.mrf.mxu1 }
 0x229   :  { %v4033_v35 = vadd.f32 %v270_v34, %v191_v33  ;;  %v4048_v47 = vmul.f32 0.17677669, %v276_v43 }
 0x22a   :  { %v3330_v36 = vpop.f32.mrf.mxu1 }
 0x22b   :  { %v4036_v37 = vmul.f32 0.17677669, %v4033_v35  ;;  %v286_v48 = vadd.f32 %v3330_v36, %v191_v33 }
 0x22c   :  { %v280_v39 = vpop.f32.mrf.mxu1 }
 0x22d   :  { %3344 = vmatprep.mubr.msk.f32.mxu0 %vm134_vm0, %v4036_v37  ;;  %v281_v45 = vadd.f32 %v280_v39, %v191_v33  ;;  %v4058_v50 = vmul.f32 0.17677669, %v286_v48 }
 0x22e   :  { %v3341_v40 = vpop.f32.mrf.mxu1 }
 0x22f   :  { %v411_v46 = vadd.f32 %v3341_v40, %v4042_v41  ;;  %v4051_v49 = vmul.f32 0.17677669, %v281_v45 }
 0x230   :  { %v405_v42 = vpop.f32.mrf.mxu1 }
 0x231   :  { %v406_v44 = vadd.f32 %v405_v42, %v4042_v41 }
 0x233   :  { %3342 = vmatprep.subr.msk.mxu0 %vm134_vm0, %v406_v44 }
 0x234   :  { %3343 = vmatpush3.xpose.msk.msra.mxu0 %vm134_vm0, %v406_v44 }
 0x235   :  { %3347 = vmatprep.subr.msk.mxu0 %vm134_vm0, %v411_v46 }
 0x237   :  { %3345 = vmatmul.mubr.msk.f32.vlgmr.msra.gmra.mxu0 %vm134_vm0, %v4048_v47 }
 0x238   :  { %3348 = vmatpush3.xpose.msk.msra.mxu0 %vm134_vm0, %v411_v46  ;;  %3349 = vmatprep.mubr.msk.f32.mxu0 %vm134_vm0, %v4051_v49 }
 0x239   :  { %3359 = vmatprep.subr.mxu0 %v3861_v18 }
 0x23b   :  { %3350 = vmatmul.mubr.msk.f32.vlgmr.msra.gmra.mxu0 %vm134_vm0, %v4058_v50 }
 0x23c   :  { %3363 = vmatprep.mubr.msk.f32.mxu0 %vm3863_vm2, %v3861_v18 }
 0x2f7   :  { %v3346_v51 = vpop.f32.mrf.mxu0 }
 0x2f8   :  { %v586_v52 = vsel %vm582_vm1, %v3346_v51, -inf }
 0x2f9   :  { %587 = vmax.xlane.f32.xlu1 %v586_v52  ;;  %v489_v53 = vpop.f32.mrf.mxu0 }
 0x2fa   :  { %v583_v54 = vsel %vm582_vm1, %v489_v53, -inf }
 0x2fb   :  { %584 = vmax.xlane.f32.xlu0 %v583_v54  ;;  %v3351_v55 = vpop.f32.mrf.mxu0 }
 0x2fc   :  { %v592_v56 = vsel %vm582_vm1, %v3351_v55, -inf }
 0x2fd   :  { %593 = vmax.xlane.f32.xlu1 %v592_v56  ;;  %v573_v58 = vpop.f32.mrf.mxu0 }
 0x2fe   :  { %v589_v59 = vsel %vm582_vm1, %v573_v58, -inf }
 0x2ff   :  { %590 = vmax.xlane.f32.xlu0 %v589_v59 }
 0x382   :  { %v588_v60 = vpop.xlane.xlu1 %587 }
 0x383   :  { %v596_v61 = vsub.f32 %v3346_v51, %v588_v60 }
 0x384   :  { %v585_v62 = vpop.xlane.xlu0 %584 }
 0x385   :  { %v601_v63 = vmul.f32 1.442695, %v596_v61  ;;  %v595_v0 = vsub.f32 %v489_v53, %v585_v62 }
 0x386   :  { %v594_v2 = vpop.xlane.xlu1 %593 }
 0x387   :  { %3607 = vpow2.f32 %v601_v63  ;;  %v599_v3 = vmul.f32 1.442695, %v595_v0  ;;  %v598_v4 = vsub.f32 %v3351_v55, %v594_v2 }
 0x388   :  { %v591_v5 = vpop.xlane.xlu0 %590 }
 0x389   :  { %3609 = vpow2.f32 %v599_v3  ;;  %v605_v6 = vmul.f32 1.442695, %v598_v4  ;;  %v597_v7 = vsub.f32 %v573_v58, %v591_v5 }
 0x38b   :  { %3611 = vpow2.f32 %v605_v6  ;;  %v603_v8 = vmul.f32 1.442695, %v597_v7 }
 0x38d   :  { %3613 = vpow2.f32 %v603_v8  ;;  %v4102_v8 = vld [vmem:[%s4620_s5 + $0x38] sm:$0xff] }
 0x394   :  { %v3608_v9 = vpop.eup %3607 }
 0x395   :  { %v610_v11 = vsel %vm582_vm1, %v3608_v9, 0.0 }
 0x396   :  { %v3610_v12 = vpop.eup %3609  ;;  %611 = vadd.xlane.f32.xlu1 %v610_v11 }
 0x397   :  { %v607_v13 = vsel %vm582_vm1, %v3610_v12, 0.0 }
 0x398   :  { %v3612_v14 = vpop.eup %3611  ;;  %608 = vadd.xlane.f32.xlu0 %v607_v13 }
 0x399   :  { %v616_v15 = vsel %vm582_vm1, %v3612_v14, 0.0 }
 0x39a   :  { %v3614_v16 = vpop.eup %3613  ;;  %617 = vadd.xlane.f32.xlu1 %v616_v15  ;;  %v4119_v15 = vld [vmem:[%s4620_s5 + $0x28] sm:$0xff] }
 0x39b   :  { %v613_v17 = vsel %vm582_vm1, %v3614_v16, 0.0 }
 0x39c   :  { %614 = vadd.xlane.f32.xlu0 %v613_v17  ;;  %v4141_v17 = vld [vmem:[%s4620_s5 + $0x10] sm:$0xff] }
 0x3ab   :  { %805 = vrot.lane.b32.xlu1 %v286_v48, %s3862_s0 }
 0x3af   :  { %689 = vrot.lane.b32.xlu1 %v4033_v35, %s3862_s0 }
 0x3b2   :  { %691 = vrot.lane.b32.xlu0 %v276_v43, %s3862_s0 }
 0x3b3   :  { %803 = vrot.lane.b32.xlu1 %v281_v45, %s3862_s0 }
 0x41f   :  { %v612_v21 = vpop.xlane.xlu1 %611 }
 0x420   :  { %3615 = vrcp.f32 %v612_v21  ;;  %v4150_v21 = vld [vmem:[%s4620_s5 + $0x8] sm:$0xff] }
 0x421   :  { %v609_v23 = vpop.xlane.xlu0 %608 }
 0x422   :  { %3617 = vrcp.f32 %v609_v23  ;;  %v4157_v23 = vld [vmem:[%s4620_s5] sm:$0xff] }
 0x423   :  { %v618_v25 = vpop.xlane.xlu1 %617 }
 0x424   :  { %3619 = vrcp.f32 %v618_v25 }
 0x425   :  { %v615_v26 = vpop.xlane.xlu0 %614 }
 0x426   :  { %3621 = vrcp.f32 %v615_v26 }
 0x427   :  { %v4081_v27 = vpop.permute.xlu1 %805 }
 0x428   :  { %3360 = vmatpush3.msra.mxu0 %v4081_v27 }
 0x429   :  { %v4084_v29 = vpop.permute.xlu0 %691  ;;  %3361 = vmatprep.subr.mxu0 %v3861_v18 }
 0x42a   :  { %3353 = vmatpush3.msra.mxu1 %v4084_v29 }
 0x42b   :  { %v4088_v30 = vpop.permute.xlu1 %689  ;;  %3354 = vmatprep.subr.mxu1 %v3861_v18 }
 0x42c   :  { %3355 = vmatpush3.msra.mxu1 %v4088_v30 }
 0x42d   :  { %v3616_v31 = vpop.eup %3615  ;;  %3366 = vmatprep.subr.mxu1 %v4102_v8 }
 0x42e   :  { %v624_v32 = vmul.f32 %v3616_v31, %v3608_v9 }
 0x42f   :  { %v3618_v33 = vpop.eup %3617  ;;  %v4092_v34 = vpop.permute.xlu1 %803 }
 0x430   :  { %3362 = vmatpush3.msra.mxu0 %v4092_v34  ;;  %v623_v35 = vmul.f32 %v3618_v33, %v3610_v12  ;;  %v628_v36 = vadd.f32 1e-08, %v624_v32 }
 0x431   :  { %v3620_v38 = vpop.eup %3619 }
 0x432   :  { %v627_v39 = vadd.f32 1e-08, %v623_v35  ;;  %v626_v40 = vmul.f32 %v3620_v38, %v3612_v14  ;;  %v632_v44 = vsel %vm582_vm1, %v628_v36, 0.0  ;;  %v4112_v14 = vld [vmem:[%s4620_s5 + $0x30] sm:$0xff] }
 0x433   :  { %v3622_v42 = vpop.eup %3621 }
 0x434   :  { %v631_v43 = vsel %vm582_vm1, %v627_v39, 0.0  ;;  %v625_v45 = vmul.f32 %v3622_v42, %v3614_v16  ;;  %v630_v46 = vadd.f32 1e-08, %v626_v40  ;;  %v4134_v16 = vld [vmem:[%s4620_s5 + $0x18] sm:$0xff] }
 0x435   :  { %v633_v48 = vadd.f32 %v632_v44, %v631_v43 }
 0x436   :  { %v629_v51 = vadd.f32 1e-08, %v625_v45  ;;  %v641_v54 = vsel %vm582_vm1, %v630_v46, 0.0 }
 0x437   :  { %v634_v52 = vrot.slane %v633_v48, 4 }
 0x438   :  { %v640_v53 = vsel %vm582_vm1, %v629_v51, 0.0 }
 0x439   :  { %v635_v55 = vadd.f32 %v634_v52, %v633_v48  ;;  %v642_v56 = vadd.f32 %v641_v54, %v640_v53 }
 0x43b   :  { %v636_v58 = vrot.slane %v635_v55, 2  ;;  %v643_v59 = vrot.slane %v642_v56, 4 }
 0x43d   :  { %v637_v60 = vadd.f32 %v636_v58, %v635_v55  ;;  %v644_v61 = vadd.f32 %v643_v59, %v642_v56 }
 0x43f   :  { %v638_v62 = vrot.slane %v637_v60, 1  ;;  %v645_v63 = vrot.slane %v644_v61, 2 }
 0x441   :  { %v639_v0 = vadd.f32 %v638_v62, %v637_v60  ;;  %v646_v2 = vadd.f32 %v645_v63, %v644_v61 }
 0x443   :  { %3623 = vrcp.f32 %v639_v0  ;;  %v647_v3 = vrot.slane %v646_v2, 1 }
 0x445   :  { %v648_v4 = vadd.f32 %v647_v3, %v646_v2 }
 0x447   :  { %3625 = vrcp.f32 %v648_v4 }
 0x450   :  { %v3624_v5 = vpop.eup %3623 }
 0x451   :  { %v651_v6 = vmul.f32 %v3624_v5, %v627_v39  ;;  %v652_v9 = vmul.f32 %v3624_v5, %v628_v36  ;;  %v92_v39 = vsub.s32 2, %v3936_v1 }
 0x453   :  { %655 = vxpose.xlu0.b32.start [1/2] (short) (narrow) %v651_v6, 8  ;;  %v4175_v40 = vrot.slane %v3957_v10, %v92_v39 }
 0x454   :  { %v3626_v7 = vpop.eup %3625 }
 0x455   :  { %v653_v11 = vmul.f32 %v3626_v7, %v629_v51  ;;  %v654_v12 = vmul.f32 %v3626_v7, %v630_v46 }
 0x457   :  { %656 = vxpose.xlu0.b32.end [2/2] (short) (narrow) %v652_v9, 8  ;;  %769 = vxpose.xlu1.b32.start [1/2] (short) (narrow) %v653_v11, 8 }
 0x45b   :  { %770 = vxpose.xlu1.b32.end [2/2] (short) (narrow) %v654_v12, 8 }
 0x479   :  { %886 = vrot.lane.b32.xlu1 %v3965_v20, %s3864_s14 }
 0x480   :  { %884 = vrot.lane.b32.xlu0 %v3963_v19, %s3864_s14  ;;  %v4126_v19 = vld [vmem:[%s4620_s5 + $0x20] sm:$0xff] }
 0x4cf   :  { %v671_v13 = vpop.trf.xlu0 }
 0x4d0   :  { %3357 = vmatmul.mubr.msk.f32.vlgmr.msra.gmra.mxu1 %vm695_vm3, %v671_v13 }
 0x4d1   :  { %3367 = vmatpush3.msra.mxu1 %v4102_v8 }
 0x4d2   :  { %3368 = vmatprep.subr.mxu1 %v4112_v14 }
 0x4d3   :  { %v785_v20 = vpop.trf.xlu1  ;;  %3369 = vmatpush3.msra.mxu1 %v4112_v14 }
 0x4d4   :  { %3364 = vmatmul.mubr.msk.f32.vlgmr.msra.gmra.mxu0 %vm695_vm3, %v785_v20  ;;  %3370 = vmatprep.subr.mxu1 %v4119_v15 }
 0x4d5   :  { %3371 = vmatpush3.msra.mxu1 %v4119_v15 }
 0x4d6   :  { %3372 = vmatprep.subr.mxu1 %v4126_v19 }
 0x4d7   :  { %3373 = vmatpush3.msra.mxu1 %v4126_v19 }
 0x4d8   :  { %3374 = vmatprep.subr.mxu1 %v4134_v16 }
 0x4d9   :  { %3375 = vmatpush3.msra.mxu1 %v4134_v16 }
 0x4da   :  { %3376 = vmatprep.subr.mxu1 %v4141_v17 }
 0x4db   :  { %3377 = vmatpush3.msra.mxu1 %v4141_v17 }
 0x4dc   :  { %3378 = vmatprep.subr.mxu1 %v4150_v21 }
 0x4dd   :  { %3379 = vmatpush3.msra.mxu1 %v4150_v21 }
 0x4de   :  { %3380 = vmatprep.subr.mxu1 %v4157_v23 }
 0x4df   :  { %3381 = vmatpush3.msra.mxu1 %v4157_v23 }
 0x4e0   :  { %3415 = vmatprep.subr.mxu1 %v4003_v57 }
 0x4eb   :  { %v887_v33 = vpop.permute.xlu1 %886 }
 0x4f2   :  { %v885_v25 = vpop.permute.xlu0 %884 }
 0x590   :  { %v765_v26 = vpop.f32.mrf.mxu1 }
 0x591   :  { %v890_v31 = vsel %vm134_vm0, %v765_v26, %v885_v25 }
 0x592   :  { %v3358_v32 = vpop.f32.mrf.mxu1  ;;  %3382 = vmatprep.mubr.msk.f32.mxu1 %vm892_vm4, %v890_v31 }
 0x594   :  { %v878_v35 = vpop.f32.mrf.mxu0 }
 0x595   :  { %v891_v36 = vsel %vm134_vm0, %v878_v35, %v887_v33 }
 0x596   :  { %v3365_v38 = vpop.f32.mrf.mxu0  ;;  %3383 = vmatmul.mubr.msk.f32.vlgmr.msra.gmra.mxu1 %vm892_vm4, %v891_v36 }
 0x597   :  { %3416 = vmatpush3.msra.mxu1 %v4003_v57 }
 0x598   :  { %3417 = vmatprep.subr.mxu1 %v4010_v22 }
 0x599   :  { %3418 = vmatpush3.msra.mxu1 %v4010_v22 }
 0x59a   :  { %3419 = vmatprep.subr.mxu1 %v4015_v24 }
 0x59b   :  { %3420 = vmatpush3.msra.mxu1 %v4015_v24 }
 0x59c   :  { %3421 = vmatprep.subr.mxu1 %v4021_v28 }
 0x59d   :  { %3422 = vmatpush3.msra.mxu1 %v4021_v28 }
 0x656   :  { %v3384_v42 = vpop.f32.mrf.mxu1 }
 0x657   :  { %v971_v57 = vadd.f32 %v3384_v42, %v4175_v40 }
 0x658   :  { %v965_v43 = vpop.f32.mrf.mxu1 }
 0x659   :  { %v966_v44 = vadd.f32 %v965_v43, %v4175_v40  ;;  %990 = vrot.lane.b32.xlu1 %v971_v57, %s3864_s14  ;;  %v3136_v22 = vmul.f32 -1.442695, %v971_v57 }
 0x65b   :  { %988 = vrot.lane.b32.xlu0 %v966_v44, %s3864_s14  ;;  %v3135_v24 = vmul.f32 -1.442695, %v966_v44  ;;  %3627 = vpow2.f32 %v3136_v22 }
 0x65d   :  { %3629 = vpow2.f32 %v3135_v24  ;;  %v4201_v24 = vld [vmem:[#allocation8 + $0x18] sm:$0xff] }
 0x65e   :  { %3385 = vmatprep.subr.mxu0 %v4201_v24 }
 0x65f   :  { %3386 = vmatpush3.msra.mxu0 %v4201_v24 }
 0x668   :  { %v3628_v28 = vpop.eup %3627 }
 0x669   :  { %v981_v46 = vadd.f32 1.0, %v3628_v28  ;;  %v4203_v28 = vld [vmem:[#allocation8 + $0x10] sm:$0xff] }
 0x66a   :  { %v3630_v45 = vpop.eup %3629  ;;  %3387 = vmatprep.subr.mxu0 %v4203_v28 }
 0x66b   :  { %v980_v48 = vadd.f32 1.0, %v3630_v45  ;;  %3631 = vrcp.f32 %v981_v46  ;;  %v4207_v45 = vld [vmem:[#allocation8 + $0x8] sm:$0xff]  ;;  %3388 = vmatpush3.msra.mxu0 %v4203_v28 }
 0x66c   :  { %3389 = vmatprep.subr.mxu0 %v4207_v45 }
 0x66d   :  { %3633 = vrcp.f32 %v980_v48  ;;  %3390 = vmatpush3.msra.mxu0 %v4207_v45 }
 0x678   :  { %v3632_v51 = vpop.eup %3631 }
 0x679   :  { %v1009_v0 = vsub.f32 1.0, %v3632_v51  ;;  %v1021_v3 = vmul.f32 %v3632_v51, %v887_v33 }
 0x67a   :  { %v3634_v54 = vpop.eup %3633 }
 0x67b   :  { %v1008_v5 = vsub.f32 1.0, %v3634_v54  ;;  %v1020_v9 = vmul.f32 %v3634_v54, %v885_v25 }
 0x6cb   :  { %v991_v52 = vpop.permute.xlu1 %990 }
 0x6cc   :  { %v995_v53 = vmul.f32 %v3632_v51, %v991_v52 }
 0x6cd   :  { %v989_v55 = vpop.permute.xlu0 %988 }
 0x6ce   :  { %v994_v56 = vmul.f32 %v3634_v54, %v989_v55  ;;  %1000 = vrot.lane.b32.xlu1 %v995_v53, %s3865_s26  ;;  %v4213_v55 = vld [vmem:[#allocation8] sm:$0xff] }
 0x6cf   :  { %3391 = vmatprep.subr.mxu0 %v4213_v55 }
 0x6d0   :  { %998 = vrot.lane.b32.xlu0 %v994_v56, %s3865_s26  ;;  %3392 = vmatpush3.msra.mxu0 %v4213_v55  ;;  %v4220_v56 = vld [vmem:[%s4622_s7 + $0x38] sm:$0xff] }
 0x6d1   :  { %3396 = vmatprep.subr.mxu0 %v4220_v56 }
 0x740   :  { %v1001_v58 = vpop.permute.xlu1 %1000 }
 0x741   :  { %v1005_v59 = vadd.f32 %v1001_v58, %v971_v57 }
 0x742   :  { %v999_v60 = vpop.permute.xlu0 %998 }
 0x743   :  { %3635 = vtanh.f32 %v1005_v59  ;;  %v1004_v61 = vadd.f32 %v999_v60, %v966_v44 }
 0x745   :  { %3637 = vtanh.f32 %v1004_v61 }
 0x750   :  { %v3636_v62 = vpop.eup %3635 }
 0x751   :  { %1014 = vrot.lane.b32.xlu1 %v3636_v62, %s3862_s0 }
 0x752   :  { %v3638_v63 = vpop.eup %3637 }
 0x753   :  { %1012 = vrot.lane.b32.xlu0 %v3638_v63, %s3862_s0 }
 0x7c3   :  { %v1015_v2 = vpop.permute.xlu1 %1014 }
 0x7c4   :  { %v1019_v4 = vmul.f32 %v1015_v2, %v1009_v0  ;;  %v4229_v0 = vld [vmem:[%s4622_s7 + $0x30] sm:$0xff]  ;;  %v4236_v2 = vld [vmem:[%s4622_s7 + $0x28] sm:$0xff] }
 0x7c5   :  { %v1013_v6 = vpop.permute.xlu0 %1012 }
 0x7c6   :  { %v4185_v7 = vadd.f32 %v1021_v3, %v1019_v4  ;;  %v1018_v11 = vmul.f32 %v1013_v6, %v1008_v5  ;;  %v4243_v3 = vld [vmem:[%s4622_s7 + $0x20] sm:$0xff]  ;;  %v4252_v4 = vld [vmem:[%s4622_s7 + $0x18] sm:$0xff]  ;;  %v4259_v5 = vld [vmem:[%s4622_s7 + $0x10] sm:$0xff] }
 0x7c7   :  { %v4266_v6 = vld [vmem:[%s4622_s7 + $0x8] sm:$0xff] }
 0x7c8   :  { %v4187_v12 = vadd.f32 %v1020_v9, %v1018_v11  ;;  %1028 = vrot.lane.b32.xlu1 %v4185_v7, %s3862_s0  ;;  %v4272_v9 = vld [vmem:[%s4622_s7] sm:$0xff]  ;;  %v96_v11 = vsub.s32 3, %v3936_v1 }
 0x7ca   :  { %1026 = vrot.lane.b32.xlu0 %v4187_v12, %s3862_s0 }
 0x83a   :  { %v1029_v13 = vpop.permute.xlu1 %1028 }
 0x83b   :  { %v1035_v20 = vsel %vm134_vm0, %v1029_v13, 0.0  ;;  %v4279_v13 = vrot.slane %v3957_v10, %v96_v11 }
 0x83c   :  { %1036 = vadd.xlane.f32.xlu1 %v1035_v20  ;;  %v1027_v26 = vpop.permute.xlu0 %1026 }
 0x83d   :  { %v1032_v31 = vsel %vm134_vm0, %v1027_v26, 0.0 }
 0x83e   :  { %1033 = vadd.xlane.f32.xlu0 %v1032_v31 }
 0x8c5   :  { %v1037_v32 = vpop.xlane.xlu1 %1036 }
 0x8c6   :  { %v1039_v33 = vmul.f32 0.03125, %v1037_v32 }
 0x8c7   :  { %v1034_v25 = vpop.xlane.xlu0 %1033 }
 0x8c8   :  { %v1041_v35 = vsub.f32 %v4185_v7, %v1039_v33  ;;  %v1038_v36 = vmul.f32 0.03125, %v1034_v25 }
 0x8ca   :  { %v1040_v38 = vsub.f32 %v4187_v12, %v1038_v36  ;;  %v1043_v39 = vmul.f32 %v1041_v35, %v1041_v35 }
 0x8cc   :  { %1048 = vrot.lane.b32.xlu1 %v1043_v39, %s3862_s0  ;;  %v1042_v42 = vmul.f32 %v1040_v38, %v1040_v38 }
 0x8ce   :  { %1046 = vrot.lane.b32.xlu0 %v1042_v42, %s3862_s0 }
 0x93e   :  { %v1049_v57 = vpop.permute.xlu1 %1048 }
 0x93f   :  { %v1055_v43 = vsel %vm134_vm0, %v1049_v57, 0.0 }
 0x940   :  { %1056 = vadd.xlane.f32.xlu1 %v1055_v43  ;;  %v1047_v44 = vpop.permute.xlu0 %1046 }
 0x941   :  { %v1052_v22 = vsel %vm134_vm0, %v1047_v44, 0.0 }
 0x942   :  { %1053 = vadd.xlane.f32.xlu0 %v1052_v22 }
 0x9c9   :  { %v1057_v46 = vpop.xlane.xlu1 %1056 }
 0x9ca   :  { %v1059_v48 = vmul.f32 0.03125, %v1057_v46 }
 0x9cb   :  { %v1054_v51 = vpop.xlane.xlu0 %1053 }
 0x9cc   :  { %v1061_v52 = vadd.f32 1e-05, %v1059_v48  ;;  %v1058_v53 = vmul.f32 0.03125, %v1054_v51 }
 0x9ce   :  { %3639 = vrsqrt.f32 %v1061_v52  ;;  %v1060_v54 = vadd.f32 1e-05, %v1058_v53 }
 0x9d0   :  { %3641 = vrsqrt.f32 %v1060_v54 }
 0x9db   :  { %v3640_v58 = vpop.eup %3639 }
 0x9dc   :  { %v1065_v59 = vmul.f32 %v3640_v58, %v1041_v35  ;;  %v100_v35 = vsub.s32 4, %v3936_v1 }
 0x9dd   :  { %v3642_v60 = vpop.eup %3641 }
 0x9de   :  { %1070 = vrot.lane.b32.xlu1 %v1065_v59, %s3862_s0  ;;  %v1064_v61 = vmul.f32 %v3642_v60, %v1040_v38  ;;  %v101_v39 = vrot.slane %v3957_v10, %v100_v35 }
 0x9e0   :  { %1068 = vrot.lane.b32.xlu0 %v1064_v61, %s3862_s0 }
 0xa50   :  { %v1071_v63 = vpop.permute.xlu1 %1070 }
 0xa52   :  { %v1069_v62 = vpop.permute.xlu0 %1068 }
 0xa53   :  { %3393 = vmatprep.mubr.msk.f32.mxu0 %vm134_vm0, %v1069_v62 }
 0xa54   :  { %3394 = vmatmul.mubr.msk.f32.vlgmr.msra.gmra.mxu0 %vm134_vm0, %v1071_v63 }
 0xa55   :  { %3397 = vmatpush3.msra.mxu0 %v4220_v56 }
 0xa56   :  { %3398 = vmatprep.subr.mxu0 %v4229_v0 }
 0xa57   :  { %3399 = vmatpush3.msra.mxu0 %v4229_v0 }
 0xa58   :  { %3400 = vmatprep.subr.mxu0 %v4236_v2 }
 0xa59   :  { %3401 = vmatpush3.msra.mxu0 %v4236_v2 }
 0xa5a   :  { %3402 = vmatprep.subr.mxu0 %v4243_v3 }
 0xa5b   :  { %3403 = vmatpush3.msra.mxu0 %v4243_v3 }
 0xa5c   :  { %3404 = vmatprep.subr.mxu0 %v4252_v4 }
 0xa5d   :  { %3405 = vmatpush3.msra.mxu0 %v4252_v4 }
 0xa5e   :  { %3406 = vmatprep.subr.mxu0 %v4259_v5 }
 0xa5f   :  { %3407 = vmatpush3.msra.mxu0 %v4259_v5 }
 0xa60   :  { %3408 = vmatprep.subr.mxu0 %v4266_v6 }
 0xa61   :  { %3409 = vmatpush3.msra.mxu0 %v4266_v6 }
 0xa62   :  { %3410 = vmatprep.subr.mxu0 %v4272_v9 }
 0xa63   :  { %3411 = vmatpush3.msra.mxu0 %v4272_v9 }
 0xb14   :  { %v3395_v20 = vpop.f32.mrf.mxu0 }
 0xb15   :  { %v1148_v26 = vadd.f32 %v3395_v20, %v4279_v13 }
 0xb16   :  { %v1142_v31 = vpop.f32.mrf.mxu0 }
 0xb17   :  { %v1143_v32 = vadd.f32 %v1142_v31, %v4279_v13  ;;  %v1152_v25 = vmax.f32 %v1148_v26, 0.0 }
 0xb19   :  { %v1151_v33 = vmax.f32 %v1143_v32, 0.0 }
 0xb1b   :  { %3412 = vmatprep.mubr.msk.f32.mxu0 %vm892_vm4, %v1151_v33 }
 0xb1c   :  { %3413 = vmatmul.mubr.msk.f32.vlgmr.msra.gmra.mxu0 %vm892_vm4, %v1152_v25 }
 0xb1d   :  { %3433 = vmatprep.mubr.msk.f32.mxu0 %vm134_vm0, %v4051_v49 }
 0xbdc   :  { %v3414_v36 = vpop.f32.mrf.mxu0 }
 0xbdd   :  { %1238 = vrot.lane.b32.xlu1 %v3414_v36, %s3864_s14 }
 0xbde   :  { %v1225_v38 = vpop.f32.mrf.mxu0 }
 0xbdf   :  { %1236 = vrot.lane.b32.xlu0 %v1225_v38, %s3864_s14 }
 0xbe3   :  { %1245 = vrot.lane.b32.xlu0 %v101_v39, %s3864_s14 }
 0xc4f   :  { %v1239_v42 = vpop.permute.xlu1 %1238 }
 0xc50   :  { %v1243_v43 = vadd.f32 %v1239_v42, %v4185_v7 }
 0xc51   :  { %v1237_v57 = vpop.permute.xlu0 %1236 }
 0xc52   :  { %v1242_v44 = vadd.f32 %v1237_v57, %v4187_v12 }
 0xc55   :  { %v4294_v22 = vpop.permute.xlu0 %1245 }
 0xc56   :  { %v4297_v1 = vadd.f32 %v4294_v22, %v1243_v43  ;;  %v4300_v46 = vadd.f32 %v4294_v22, %v1242_v44 }
 0xc58   :  { %1254 = vrot.lane.b32.xlu0 %v4297_v1, %s3862_s0  ;;  %1252 = vrot.lane.b32.xlu1 %v4300_v46, %s3862_s0 }
 0xcca   :  { %v1255_v10 = vpop.permute.xlu0 %1254  ;;  %v1253_v48 = vpop.permute.xlu1 %1252 }
 0xccb   :  { %v1261_v7 = vsel %vm134_vm0, %v1255_v10, 0.0  ;;  %v1258_v12 = vsel %vm134_vm0, %v1253_v48, 0.0 }
 0xccc   :  { %1262 = vadd.xlane.f32.xlu0 %v1261_v7  ;;  %1259 = vadd.xlane.f32.xlu1 %v1258_v12 }
 0xd55   :  { %v1263_v51 = vpop.xlane.xlu0 %1262  ;;  %v1260_v52 = vpop.xlane.xlu1 %1259 }
 0xd56   :  { %v1265_v53 = vmul.f32 0.03125, %v1263_v51  ;;  %v1264_v54 = vmul.f32 0.03125, %v1260_v52 }
 0xd58   :  { %v1267_v58 = vsub.f32 %v4297_v1, %v1265_v53  ;;  %v1266_v59 = vsub.f32 %v4300_v46, %v1264_v54 }
 0xd5a   :  { %v1269_v60 = vmul.f32 %v1267_v58, %v1267_v58  ;;  %v1268_v61 = vmul.f32 %v1266_v59, %v1266_v59 }
 0xd5c   :  { %1274 = vrot.lane.b32.xlu1 %v1269_v60, %s3862_s0  ;;  %1272 = vrot.lane.b32.xlu0 %v1268_v61, %s3862_s0 }
 0xdce   :  { %v1273_v62 = vpop.permute.xlu0 %1272  ;;  %v1275_v63 = vpop.permute.xlu1 %1274 }
 0xdcf   :  { %v1278_v11 = vsel %vm134_vm0, %v1273_v62, 0.0  ;;  %v1281_v20 = vsel %vm134_vm0, %v1275_v63, 0.0 }
 0xdd0   :  { %1279 = vadd.xlane.f32.xlu1 %v1278_v11  ;;  %1282 = vadd.xlane.f32.xlu0 %v1281_v20 }
 0xe59   :  { %v1283_v26 = vpop.xlane.xlu0 %1282  ;;  %v1280_v31 = vpop.xlane.xlu1 %1279 }
 0xe5a   :  { %v1285_v32 = vmul.f32 0.03125, %v1283_v26  ;;  %v1284_v33 = vmul.f32 0.03125, %v1280_v31 }
 0xe5c   :  { %v1287_v25 = vadd.f32 1e-05, %v1285_v32  ;;  %v1286_v35 = vadd.f32 1e-05, %v1284_v33 }
 0xe5e   :  { %3643 = vrsqrt.f32 %v1287_v25 }
 0xe5f   :  { %3645 = vrsqrt.f32 %v1286_v35 }
 0xe6b   :  { %v3644_v36 = vpop.eup %3643 }
 0xe6c   :  { %v3646_v38 = vpop.eup %3645  ;;  %v1291_v39 = vmul.f32 %v3644_v36, %v1267_v58 }
 0xe6d   :  { %v1290_v42 = vmul.f32 %v3646_v38, %v1266_v59 }
 0xe6e   :  { %1296 = vrot.lane.b32.xlu1 %v1291_v39, %s3862_s0 }
 0xe6f   :  { %1294 = vrot.lane.b32.xlu0 %v1290_v42, %s3862_s0 }
 0xee0   :  { %v1297_v57 = vpop.permute.xlu1 %1296 }
 0xee1   :  { %v1295_v43 = vpop.permute.xlu0 %1294 }
 0xee2   :  { %3423 = vmatprep.mubr.msk.f32.mxu1 %vm134_vm0, %v1295_v43 }
 0xee3   :  { %3424 = vmatmul.mubr.msk.f32.vlgmr.msra.gmra.mxu1 %vm134_vm0, %v1297_v57 }
 0xee4   :  { %3428 = vmatprep.mubr.msk.f32.mxu1 %vm134_vm0, %v4036_v37 }
 0xfa3   :  { %v3425_v44 = vpop.f32.mrf.mxu1 }
 0xfa4   :  { %v1374_v10 = vadd.f32 %v3425_v44, %v4042_v41 }
 0xfa5   :  { %v1368_v48 = vpop.f32.mrf.mxu1 }
 0xfa6   :  { %v1369_v7 = vadd.f32 %v1368_v48, %v4042_v41  ;;  %3431 = vmatprep.subr.msk.mxu0 %vm134_vm0, %v1374_v10 }
 0xfa7   :  { %3432 = vmatpush3.xpose.msk.msra.mxu0 %vm134_vm0, %v1374_v10 }
 0xfa8   :  { %3426 = vmatprep.subr.msk.mxu1 %vm134_vm0, %v1369_v7  ;;  %3443 = vmatprep.subr.mxu0 %v3861_v18 }
 0xfa9   :  { %3427 = vmatpush3.xpose.msk.msra.mxu1 %vm134_vm0, %v1369_v7 }
 0xfaa   :  { %3434 = vmatmul.mubr.msk.f32.vlgmr.msra.gmra.mxu0 %vm134_vm0, %v4058_v50  ;;  %3436 = vmatprep.subr.mxu1 %v3861_v18 }
 0xfab   :  { %3444 = vmatpush3.msra.mxu0 %v4081_v27  ;;  %3447 = vmatprep.mubr.msk.f32.mxu0 %vm3863_vm2, %v3861_v18 }
 0xfac   :  { %3429 = vmatmul.mubr.msk.f32.vlgmr.msra.gmra.mxu1 %vm134_vm0, %v4048_v47  ;;  %3445 = vmatprep.subr.mxu0 %v3861_v18 }
 0xfad   :  { %3437 = vmatpush3.msra.mxu1 %v4084_v29  ;;  %3446 = vmatpush3.msra.mxu0 %v4092_v34 }
 0xfae   :  { %3438 = vmatprep.subr.mxu1 %v3861_v18  ;;  %3440 = vmatprep.mubr.msk.f32.mxu1 %vm3863_vm2, %v3861_v18 }
 0xfaf   :  { %3439 = vmatpush3.msra.mxu1 %v4088_v30  ;;  %3469 = vmatprep.subr.mxu0 %v4201_v24 }
 0xfb0   :  { %3450 = vmatprep.subr.mxu1 %v4102_v8 }
0x106a   :  { %v3435_v12 = vpop.f32.mrf.mxu0 }
0x106b   :  { %v1542_v60 = vsel %vm582_vm1, %v3435_v12, -inf }
0x106c   :  { %v3430_v51 = vpop.f32.mrf.mxu1  ;;  %v1524_v53 = vpop.f32.mrf.mxu0 }
0x106d   :  { %v1536_v52 = vsel %vm582_vm1, %v3430_v51, -inf  ;;  %v1539_v59 = vsel %vm582_vm1, %v1524_v53, -inf }
0x106e   :  { %1537 = vmax.xlane.f32.xlu0 %v1536_v52  ;;  %v1446_v54 = vpop.f32.mrf.mxu1 }
0x106f   :  { %v1533_v58 = vsel %vm582_vm1, %v1446_v54, -inf }
0x1070   :  { %1534 = vmax.xlane.f32.xlu1 %v1533_v58 }
0x1072   :  { %1540 = vmax.xlane.f32.xlu0 %v1539_v59 }
0x1076   :  { %1543 = vmax.xlane.f32.xlu0 %v1542_v60 }
0x10f7   :  { %v1538_v61 = vpop.xlane.xlu0 %1537 }
0x10f8   :  { %v1546_v62 = vsub.f32 %v3430_v51, %v1538_v61 }
0x10f9   :  { %v1535_v63 = vpop.xlane.xlu1 %1534 }
0x10fa   :  { %v1551_v11 = vmul.f32 1.442695, %v1546_v62  ;;  %v1545_v20 = vsub.f32 %v1446_v54, %v1535_v63 }
0x10fb   :  { %v1541_v26 = vpop.xlane.xlu0 %1540 }
0x10fc   :  { %3647 = vpow2.f32 %v1551_v11  ;;  %v1549_v31 = vmul.f32 1.442695, %v1545_v20  ;;  %v1547_v32 = vsub.f32 %v1524_v53, %v1541_v26 }
0x10fe   :  { %3649 = vpow2.f32 %v1549_v31  ;;  %v1553_v33 = vmul.f32 1.442695, %v1547_v32 }
0x10ff   :  { %v1544_v25 = vpop.xlane.xlu0 %1543 }
0x1100   :  { %3651 = vpow2.f32 %v1553_v33  ;;  %v1548_v35 = vsub.f32 %v3435_v12, %v1544_v25 }
0x1102   :  { %v1555_v36 = vmul.f32 1.442695, %v1548_v35 }
0x1104   :  { %3653 = vpow2.f32 %v1555_v36 }
0x1109   :  { %v3648_v38 = vpop.eup %3647 }
0x110a   :  { %v1560_v39 = vsel %vm582_vm1, %v3648_v38, 0.0 }
0x110b   :  { %v3650_v42 = vpop.eup %3649  ;;  %1561 = vadd.xlane.f32.xlu0 %v1560_v39 }
0x110c   :  { %v1557_v57 = vsel %vm582_vm1, %v3650_v42, 0.0 }
0x110d   :  { %v3652_v43 = vpop.eup %3651  ;;  %1558 = vadd.xlane.f32.xlu1 %v1557_v57 }
0x110e   :  { %v1563_v44 = vsel %vm582_vm1, %v3652_v43, 0.0 }
0x1111   :  { %v3654_v10 = vpop.eup %3653  ;;  %1564 = vadd.xlane.f32.xlu1 %v1563_v44 }
0x1112   :  { %v1566_v48 = vsel %vm582_vm1, %v3654_v10, 0.0 }
0x1113   :  { %1567 = vadd.xlane.f32.xlu0 %v1566_v48 }
0x1194   :  { %v1562_v7 = vpop.xlane.xlu0 %1561 }
0x1195   :  { %3655 = vrcp.f32 %v1562_v7 }
0x1196   :  { %v1559_v12 = vpop.xlane.xlu1 %1558 }
0x1197   :  { %3657 = vrcp.f32 %v1559_v12 }
0x119a   :  { %v1565_v51 = vpop.xlane.xlu1 %1564 }
0x119b   :  { %3659 = vrcp.f32 %v1565_v51 }
0x119c   :  { %v1568_v52 = vpop.xlane.xlu0 %1567 }
0x119d   :  { %3661 = vrcp.f32 %v1568_v52 }
0x11a2   :  { %v3656_v53 = vpop.eup %3655 }
0x11a3   :  { %v1574_v54 = vmul.f32 %v3656_v53, %v3648_v38 }
0x11a4   :  { %v3658_v58 = vpop.eup %3657 }
0x11a5   :  { %v1573_v59 = vmul.f32 %v3658_v58, %v3650_v42  ;;  %v1578_v60 = vadd.f32 1e-08, %v1574_v54 }
0x11a7   :  { %v1577_v61 = vadd.f32 1e-08, %v1573_v59  ;;  %v1582_v11 = vsel %vm582_vm1, %v1578_v60, 0.0 }
0x11a8   :  { %v3660_v62 = vpop.eup %3659 }
0x11a9   :  { %v1581_v63 = vsel %vm582_vm1, %v1577_v61, 0.0  ;;  %v1575_v20 = vmul.f32 %v3660_v62, %v3652_v43 }
0x11aa   :  { %v3662_v26 = vpop.eup %3661  ;;  %v1583_v31 = vadd.f32 %v1582_v11, %v1581_v63 }
0x11ab   :  { %v1576_v32 = vmul.f32 %v3662_v26, %v3654_v10  ;;  %v1579_v33 = vadd.f32 1e-08, %v1575_v20 }
0x11ac   :  { %v1584_v25 = vrot.slane %v1583_v31, 4 }
0x11ad   :  { %v1580_v35 = vadd.f32 1e-08, %v1576_v32  ;;  %v1590_v39 = vsel %vm582_vm1, %v1579_v33, 0.0 }
0x11ae   :  { %v1585_v36 = vadd.f32 %v1584_v25, %v1583_v31 }
0x11af   :  { %v1591_v38 = vsel %vm582_vm1, %v1580_v35, 0.0 }
0x11b0   :  { %v1586_v42 = vrot.slane %v1585_v36, 2  ;;  %v1592_v57 = vadd.f32 %v1591_v38, %v1590_v39 }
0x11b2   :  { %v1587_v44 = vadd.f32 %v1586_v42, %v1585_v36  ;;  %v1593_v48 = vrot.slane %v1592_v57, 4 }
0x11b4   :  { %v1588_v7 = vrot.slane %v1587_v44, 1  ;;  %v1594_v12 = vadd.f32 %v1593_v48, %v1592_v57 }
0x11b6   :  { %v1589_v51 = vadd.f32 %v1588_v7, %v1587_v44  ;;  %v1595_v52 = vrot.slane %v1594_v12, 2 }
0x11b8   :  { %3663 = vrcp.f32 %v1589_v51  ;;  %v1596_v43 = vadd.f32 %v1595_v52, %v1594_v12 }
0x11ba   :  { %v1597_v53 = vrot.slane %v1596_v43, 1 }
0x11bc   :  { %v1598_v10 = vadd.f32 %v1597_v53, %v1596_v43 }
0x11be   :  { %3665 = vrcp.f32 %v1598_v10 }
0x11c5   :  { %v3664_v54 = vpop.eup %3663 }
0x11c6   :  { %v1601_v58 = vmul.f32 %v3664_v54, %v1577_v61  ;;  %v1602_v59 = vmul.f32 %v3664_v54, %v1578_v60 }
0x11c8   :  { %1605 = vxpose.xlu1.b32.start [1/2] (short) (narrow) %v1601_v58, 8 }
0x11cb   :  { %v3666_v62 = vpop.eup %3665 }
0x11cc   :  { %1606 = vxpose.xlu1.b32.end [2/2] (short) (narrow) %v1602_v59, 8  ;;  %v1603_v63 = vmul.f32 %v3666_v62, %v1579_v33  ;;  %v1604_v11 = vmul.f32 %v3666_v62, %v1580_v35 }
0x11ce   :  { %1710 = vxpose.xlu0.b32.start [1/2] (short) (narrow) %v1603_v63, 8 }
0x11d2   :  { %1711 = vxpose.xlu0.b32.end [2/2] (short) (narrow) %v1604_v11, 8 }
0x1244   :  { %v1621_v20 = vpop.trf.xlu1 }
0x1245   :  { %3441 = vmatmul.mubr.msk.f32.vlgmr.msra.gmra.mxu1 %vm695_vm3, %v1621_v20 }
0x1246   :  { %3451 = vmatpush3.msra.mxu1 %v4102_v8  ;;  %v3723_v8 = vld [vmem:[#allocation7 + $0x18] sm:$0xff] }
0x1247   :  { %3452 = vmatprep.subr.mxu1 %v4112_v14 }
0x1248   :  { %3453 = vmatpush3.msra.mxu1 %v4112_v14 }
0x1249   :  { %3454 = vmatprep.subr.mxu1 %v4119_v15 }
0x124a   :  { %v1726_v61 = vpop.trf.xlu0  ;;  %3455 = vmatpush3.msra.mxu1 %v4119_v15 }
0x124b   :  { %3448 = vmatmul.mubr.msk.f32.vlgmr.msra.gmra.mxu0 %vm695_vm3, %v1726_v61  ;;  %3456 = vmatprep.subr.mxu1 %v4126_v19 }
0x124c   :  { %3457 = vmatpush3.msra.mxu1 %v4126_v19  ;;  %3470 = vmatpush3.msra.mxu0 %v4201_v24 }
0x124d   :  { %3458 = vmatprep.subr.mxu1 %v4134_v16  ;;  %3471 = vmatprep.subr.mxu0 %v4203_v28 }
0x124e   :  { %3459 = vmatpush3.msra.mxu1 %v4134_v16  ;;  %3472 = vmatpush3.msra.mxu0 %v4203_v28  ;;  %v3724_v28 = vld [vmem:[#allocation7 + $0x10] sm:$0xff] }
0x124f   :  { %3460 = vmatprep.subr.mxu1 %v4141_v17  ;;  %3473 = vmatprep.subr.mxu0 %v4207_v45 }
0x1250   :  { %3461 = vmatpush3.msra.mxu1 %v4141_v17  ;;  %3474 = vmatpush3.msra.mxu0 %v4207_v45  ;;  %v3726_v45 = vld [vmem:[#allocation7] sm:$0xff] }
0x1251   :  { %3462 = vmatprep.subr.mxu1 %v4150_v21  ;;  %3475 = vmatprep.subr.mxu0 %v4213_v55 }
0x1252   :  { %3463 = vmatpush3.msra.mxu1 %v4150_v21  ;;  %3476 = vmatpush3.msra.mxu0 %v4213_v55 }
0x1253   :  { %3464 = vmatprep.subr.mxu1 %v4157_v23  ;;  %3480 = vmatprep.subr.mxu0 %v4220_v56 }
0x1254   :  { %3465 = vmatpush3.msra.mxu1 %v4157_v23  ;;  %v3725_v23 = vld [vmem:[#allocation7 + $0x8] sm:$0xff] }
0x1255   :  { %3499 = vmatprep.subr.mxu1 %v3723_v8 }
0x1305   :  { %v1706_v14 = vpop.f32.mrf.mxu1 }
0x1306   :  { %v1815_v15 = vsel %vm134_vm0, %v1706_v14, %v4300_v46 }
0x1307   :  { %3466 = vmatprep.mubr.msk.f32.mxu1 %vm892_vm4, %v1815_v15  ;;  %v3442_v19 = vpop.f32.mrf.mxu1 }
0x130b   :  { %v1811_v16 = vpop.f32.mrf.mxu0 }
0x130c   :  { %v1816_v17 = vsel %vm134_vm0, %v1811_v16, %v4297_v1 }
0x130d   :  { %v3449_v21 = vpop.f32.mrf.mxu0  ;;  %3467 = vmatmul.mubr.msk.f32.vlgmr.msra.gmra.mxu1 %vm892_vm4, %v1816_v17 }
0x130e   :  { %3500 = vmatpush3.msra.mxu1 %v3723_v8 }
0x130f   :  { %3501 = vmatprep.subr.mxu1 %v3724_v28 }
0x1310   :  { %3502 = vmatpush3.msra.mxu1 %v3724_v28 }
0x1311   :  { %3503 = vmatprep.subr.mxu1 %v3725_v23 }
0x1312   :  { %3504 = vmatpush3.msra.mxu1 %v3725_v23 }
0x1313   :  { %3505 = vmatprep.subr.mxu1 %v3726_v45 }
0x1314   :  { %3506 = vmatpush3.msra.mxu1 %v3726_v45 }
0x13cd   :  { %v3468_v55 = vpop.f32.mrf.mxu1 }
0x13ce   :  { %v1895_v60 = vadd.f32 %v3468_v55, %v4175_v40 }
0x13cf   :  { %v1889_v26 = vpop.f32.mrf.mxu1 }
0x13d0   :  { %v1890_v31 = vadd.f32 %v1889_v26, %v4175_v40  ;;  %1914 = vrot.lane.b32.xlu1 %v1895_v60, %s3864_s14  ;;  %v3154_v33 = vmul.f32 -1.442695, %v1895_v60 }
0x13d2   :  { %1912 = vrot.lane.b32.xlu0 %v1890_v31, %s3864_s14  ;;  %v3153_v32 = vmul.f32 -1.442695, %v1890_v31 }
0x13d4   :  { %3667 = vpow2.f32 %v3153_v32 }
0x13d5   :  { %3669 = vpow2.f32 %v3154_v33 }
0x13e1   :  { %v3668_v25 = vpop.eup %3667 }
0x13e2   :  { %v1904_v35 = vadd.f32 1.0, %v3668_v25  ;;  %v3670_v36 = vpop.eup %3669 }
0x13e3   :  { %v1905_v39 = vadd.f32 1.0, %v3670_v36 }
0x13e4   :  { %3671 = vrcp.f32 %v1904_v35 }
0x13e5   :  { %3673 = vrcp.f32 %v1905_v39 }
0x13f1   :  { %v3672_v38 = vpop.eup %3671 }
0x13f2   :  { %v3674_v48 = vpop.eup %3673  ;;  %v1932_v54 = vsub.f32 1.0, %v3672_v38  ;;  %v1944_v59 = vmul.f32 %v3672_v38, %v4300_v46 }
0x13f3   :  { %v1933_v11 = vsub.f32 1.0, %v3674_v48  ;;  %v1945_v61 = vmul.f32 %v3674_v48, %v4297_v1 }
0x1442   :  { %v1915_v44 = vpop.permute.xlu1 %1914 }
0x1443   :  { %v1919_v7 = vmul.f32 %v3674_v48, %v1915_v44 }
0x1444   :  { %v1913_v42 = vpop.permute.xlu0 %1912 }
0x1445   :  { %v1918_v57 = vmul.f32 %v3672_v38, %v1913_v42 }
0x1447   :  { %1922 = vrot.lane.b32.xlu1 %v1918_v57, %s3865_s26 }
0x144b   :  { %1924 = vrot.lane.b32.xlu1 %v1919_v7, %s3865_s26 }
0x14b9   :  { %v1923_v12 = vpop.permute.xlu1 %1922 }
0x14ba   :  { %v1928_v51 = vadd.f32 %v1923_v12, %v1890_v31 }
0x14bc   :  { %3675 = vtanh.f32 %v1928_v51 }
0x14bd   :  { %v1925_v52 = vpop.permute.xlu1 %1924 }
0x14be   :  { %v1929_v43 = vadd.f32 %v1925_v52, %v1895_v60 }
0x14c0   :  { %3677 = vtanh.f32 %v1929_v43 }
0x14c9   :  { %v3676_v53 = vpop.eup %3675 }
0x14ca   :  { %1936 = vrot.lane.b32.xlu1 %v3676_v53, %s3862_s0 }
0x14cd   :  { %v3678_v10 = vpop.eup %3677 }
0x14ce   :  { %1938 = vrot.lane.b32.xlu0 %v3678_v10, %s3862_s0 }
0x153c   :  { %v1937_v58 = vpop.permute.xlu1 %1936 }
0x153d   :  { %v1942_v62 = vmul.f32 %v1937_v58, %v1932_v54 }
0x153f   :  { %v4396_v63 = vadd.f32 %v1944_v59, %v1942_v62 }
0x1540   :  { %v1939_v20 = vpop.permute.xlu0 %1938 }
0x1541   :  { %v1943_v8 = vmul.f32 %v1939_v20, %v1933_v11  ;;  %1950 = vrot.lane.b32.xlu1 %v4396_v63, %s3862_s0 }
0x1543   :  { %v4401_v14 = vadd.f32 %v1945_v61, %v1943_v8 }
0x1545   :  { %1952 = vrot.lane.b32.xlu0 %v4401_v14, %s3862_s0 }
0x15b3   :  { %v1951_v15 = vpop.permute.xlu1 %1950 }
0x15b4   :  { %v1956_v19 = vsel %vm134_vm0, %v1951_v15, 0.0 }
0x15b5   :  { %1957 = vadd.xlane.f32.xlu1 %v1956_v19 }
0x15b7   :  { %v1953_v46 = vpop.permute.xlu0 %1952 }
0x15b8   :  { %v1959_v16 = vsel %vm134_vm0, %v1953_v46, 0.0 }
0x15b9   :  { %1960 = vadd.xlane.f32.xlu0 %v1959_v16 }
0x163e   :  { %v1958_v17 = vpop.xlane.xlu1 %1957 }
0x163f   :  { %v1962_v21 = vmul.f32 0.03125, %v1958_v17 }
0x1641   :  { %v1964_v1 = vsub.f32 %v4396_v63, %v1962_v21 }
0x1642   :  { %v1961_v28 = vpop.xlane.xlu0 %1960 }
0x1643   :  { %v1963_v23 = vmul.f32 0.03125, %v1961_v28  ;;  %v1966_v45 = vmul.f32 %v1964_v1, %v1964_v1 }
0x1645   :  { %v1965_v55 = vsub.f32 %v4401_v14, %v1963_v23  ;;  %1970 = vrot.lane.b32.xlu0 %v1966_v45, %s3862_s0 }
0x1647   :  { %v1967_v60 = vmul.f32 %v1965_v55, %v1965_v55 }
0x1649   :  { %1972 = vrot.lane.b32.xlu1 %v1967_v60, %s3862_s0 }
0x16b7   :  { %v1971_v26 = vpop.permute.xlu0 %1970 }
0x16b8   :  { %v1976_v31 = vsel %vm134_vm0, %v1971_v26, 0.0 }
0x16b9   :  { %1977 = vadd.xlane.f32.xlu1 %v1976_v31 }
0x16bb   :  { %v1973_v32 = vpop.permute.xlu1 %1972 }
0x16bc   :  { %v1979_v33 = vsel %vm134_vm0, %v1973_v32, 0.0 }
0x16bd   :  { %1980 = vadd.xlane.f32.xlu0 %v1979_v33 }
0x1742   :  { %v1978_v25 = vpop.xlane.xlu1 %1977 }
0x1743   :  { %v1982_v35 = vmul.f32 0.03125, %v1978_v25 }
0x1745   :  { %v1984_v36 = vadd.f32 1e-05, %v1982_v35 }
0x1746   :  { %v1981_v39 = vpop.xlane.xlu0 %1980 }
0x1747   :  { %3679 = vrsqrt.f32 %v1984_v36  ;;  %v1983_v38 = vmul.f32 0.03125, %v1981_v39 }
0x1749   :  { %v1985_v42 = vadd.f32 1e-05, %v1983_v38 }
0x174b   :  { %3681 = vrsqrt.f32 %v1985_v42 }
0x1754   :  { %v3680_v57 = vpop.eup %3679 }
0x1755   :  { %v1988_v44 = vmul.f32 %v3680_v57, %v1964_v1 }
0x1757   :  { %1992 = vrot.lane.b32.xlu0 %v1988_v44, %s3862_s0 }
0x1758   :  { %v3682_v48 = vpop.eup %3681 }
0x1759   :  { %v1989_v7 = vmul.f32 %v3682_v48, %v1965_v55 }
0x175b   :  { %1994 = vrot.lane.b32.xlu1 %v1989_v7, %s3862_s0 }
0x17c9   :  { %v1993_v12 = vpop.permute.xlu0 %1992 }
0x17ca   :  { %3477 = vmatprep.mubr.msk.f32.mxu0 %vm134_vm0, %v1993_v12 }
0x17cd   :  { %v1995_v51 = vpop.permute.xlu1 %1994 }
0x17ce   :  { %3478 = vmatmul.mubr.msk.f32.vlgmr.msra.gmra.mxu0 %vm134_vm0, %v1995_v51 }
0x17cf   :  { %3481 = vmatpush3.msra.mxu0 %v4220_v56 }
0x17d0   :  { %3482 = vmatprep.subr.mxu0 %v4229_v0 }
0x17d1   :  { %3483 = vmatpush3.msra.mxu0 %v4229_v0 }
0x17d2   :  { %3484 = vmatprep.subr.mxu0 %v4236_v2 }
0x17d3   :  { %3485 = vmatpush3.msra.mxu0 %v4236_v2 }
0x17d4   :  { %3486 = vmatprep.subr.mxu0 %v4243_v3 }
0x17d5   :  { %3487 = vmatpush3.msra.mxu0 %v4243_v3 }
0x17d6   :  { %3488 = vmatprep.subr.mxu0 %v4252_v4 }
0x17d7   :  { %3489 = vmatpush3.msra.mxu0 %v4252_v4 }
0x17d8   :  { %3490 = vmatprep.subr.mxu0 %v4259_v5 }
0x17d9   :  { %3491 = vmatpush3.msra.mxu0 %v4259_v5 }
0x17da   :  { %3492 = vmatprep.subr.mxu0 %v4266_v6 }
0x17db   :  { %3493 = vmatpush3.msra.mxu0 %v4266_v6 }
0x17dc   :  { %3494 = vmatprep.subr.mxu0 %v4272_v9 }
0x17dd   :  { %3495 = vmatpush3.msra.mxu0 %v4272_v9 }
0x188e   :  { %v3479_v56 = vpop.f32.mrf.mxu0 }
0x188f   :  { %v2072_v0 = vadd.f32 %v3479_v56, %v4279_v13 }
0x1890   :  { %v2066_v2 = vpop.f32.mrf.mxu0 }
0x1891   :  { %v2067_v3 = vadd.f32 %v2066_v2, %v4279_v13  ;;  %v2076_v4 = vmax.f32 %v2072_v0, 0.0 }
0x1893   :  { %v2075_v52 = vmax.f32 %v2067_v3, 0.0 }
0x1895   :  { %3496 = vmatprep.mubr.msk.f32.mxu0 %vm892_vm4, %v2075_v52 }
0x1896   :  { %3497 = vmatmul.mubr.msk.f32.vlgmr.msra.gmra.mxu0 %vm892_vm4, %v2076_v4 }
0x1897   :  { %3517 = vmatprep.mubr.msk.f32.mxu0 %vm134_vm0, %v4051_v49 }
0x1956   :  { %v3498_v5 = vpop.f32.mrf.mxu0 }
0x1957   :  { %2162 = vrot.lane.b32.xlu0 %v3498_v5, %s3864_s14 }
0x1958   :  { %v2149_v6 = vpop.f32.mrf.mxu0 }
0x1959   :  { %2160 = vrot.lane.b32.xlu1 %v2149_v6, %s3864_s14 }
0x19c9   :  { %v2163_v9 = vpop.permute.xlu0 %2162 }
0x19ca   :  { %v2167_v43 = vadd.f32 %v2163_v9, %v4401_v14 }
0x19cb   :  { %v2161_v53 = vpop.permute.xlu1 %2160 }
0x19cc   :  { %v4442_v10 = vadd.f32 %v2167_v43, %v4294_v22  ;;  %v2166_v54 = vadd.f32 %v2161_v53, %v4396_v63 }
0x19ce   :  { %v4446_v58 = vadd.f32 %v2166_v54, %v4294_v22  ;;  %2174 = vrot.lane.b32.xlu0 %v4442_v10, %s3862_s0 }
0x19d0   :  { %2172 = vrot.lane.b32.xlu1 %v4446_v58, %s3862_s0 }
0x1a40   :  { %v2175_v49 = vpop.permute.xlu0 %2174 }
0x1a41   :  { %v2181_v59 = vsel %vm134_vm0, %v2175_v49, 0.0 }
0x1a42   :  { %2182 = vadd.xlane.f32.xlu0 %v2181_v59  ;;  %v2173_v62 = vpop.permute.xlu1 %2172 }
0x1a43   :  { %v2178_v11 = vsel %vm134_vm0, %v2173_v62, 0.0 }
0x1a44   :  { %2179 = vadd.xlane.f32.xlu1 %v2178_v11 }
0x1acb   :  { %v2183_v20 = vpop.xlane.xlu0 %2182 }
0x1acc   :  { %v2185_v61 = vmul.f32 0.03125, %v2183_v20 }
0x1acd   :  { %v2180_v63 = vpop.xlane.xlu1 %2179 }
0x1ace   :  { %v2187_v8 = vsub.f32 %v4442_v10, %v2185_v61  ;;  %v2184_v14 = vmul.f32 0.03125, %v2180_v63 }
0x1ad0   :  { %v2186_v15 = vsub.f32 %v4446_v58, %v2184_v14  ;;  %v2189_v19 = vmul.f32 %v2187_v8, %v2187_v8 }
0x1ad2   :  { %2194 = vrot.lane.b32.xlu1 %v2189_v19, %s3862_s0  ;;  %v2188_v46 = vmul.f32 %v2186_v15, %v2186_v15 }
0x1ad4   :  { %2192 = vrot.lane.b32.xlu0 %v2188_v46, %s3862_s0 }
0x1b44   :  { %v2195_v16 = vpop.permute.xlu1 %2194 }
0x1b45   :  { %v2201_v17 = vsel %vm134_vm0, %v2195_v16, 0.0 }
0x1b46   :  { %v2193_v21 = vpop.permute.xlu0 %2192  ;;  %2202 = vadd.xlane.f32.xlu0 %v2201_v17 }
0x1b47   :  { %v2198_v1 = vsel %vm134_vm0, %v2193_v21, 0.0 }
0x1b48   :  { %2199 = vadd.xlane.f32.xlu1 %v2198_v1 }
0x1bcf   :  { %v2203_v28 = vpop.xlane.xlu0 %2202 }
0x1bd0   :  { %v2205_v23 = vmul.f32 0.03125, %v2203_v28 }
0x1bd1   :  { %v2200_v45 = vpop.xlane.xlu1 %2199 }
0x1bd2   :  { %v2207_v55 = vadd.f32 1e-05, %v2205_v23  ;;  %v2204_v60 = vmul.f32 0.03125, %v2200_v45 }
0x1bd4   :  { %3683 = vrsqrt.f32 %v2207_v55  ;;  %v2206_v26 = vadd.f32 1e-05, %v2204_v60 }
0x1bd6   :  { %3685 = vrsqrt.f32 %v2206_v26 }
0x1be1   :  { %v3684_v31 = vpop.eup %3683 }
0x1be2   :  { %v2211_v32 = vmul.f32 %v3684_v31, %v2187_v8 }
0x1be3   :  { %v3686_v33 = vpop.eup %3685 }
0x1be4   :  { %2216 = vrot.lane.b32.xlu1 %v2211_v32, %s3862_s0  ;;  %v2210_v25 = vmul.f32 %v3686_v33, %v2186_v15 }
0x1be6   :  { %2214 = vrot.lane.b32.xlu0 %v2210_v25, %s3862_s0 }
0x1c56   :  { %v2217_v36 = vpop.permute.xlu1 %2216 }
0x1c58   :  { %v2215_v35 = vpop.permute.xlu0 %2214 }
0x1c59   :  { %3507 = vmatprep.mubr.msk.f32.mxu1 %vm134_vm0, %v2215_v35 }
0x1c5a   :  { %3508 = vmatmul.mubr.msk.f32.vlgmr.msra.gmra.mxu1 %vm134_vm0, %v2217_v36 }
0x1c5b   :  { %3512 = vmatprep.mubr.msk.f32.mxu1 %vm134_vm0, %v4036_v37  ;;  %v4492_v37 = vld [vmem:[%s4620_s5 + $0x38] sm:$0xff] }
0x1d1a   :  { %v3509_v39 = vpop.f32.mrf.mxu1 }
0x1d1b   :  { %v2294_v38 = vadd.f32 %v3509_v39, %v4042_v41 }
0x1d1c   :  { %v2288_v42 = vpop.f32.mrf.mxu1 }
0x1d1d   :  { %v2289_v57 = vadd.f32 %v2288_v42, %v4042_v41  ;;  %3515 = vmatprep.subr.msk.mxu0 %vm134_vm0, %v2294_v38 }
0x1d1e   :  { %3516 = vmatpush3.xpose.msk.msra.mxu0 %vm134_vm0, %v2294_v38 }
0x1d1f   :  { %3510 = vmatprep.subr.msk.mxu1 %vm134_vm0, %v2289_v57  ;;  %3527 = vmatprep.subr.mxu0 %v3861_v18 }
0x1d20   :  { %3511 = vmatpush3.xpose.msk.msra.mxu1 %vm134_vm0, %v2289_v57 }
0x1d21   :  { %3518 = vmatmul.mubr.msk.f32.vlgmr.msra.gmra.mxu0 %vm134_vm0, %v4058_v50  ;;  %3520 = vmatprep.subr.mxu1 %v3861_v18 }
0x1d22   :  { %3528 = vmatpush3.msra.mxu0 %v4081_v27  ;;  %3531 = vmatprep.mubr.msk.f32.mxu0 %vm3863_vm2, %v3861_v18 }
0x1d23   :  { %3513 = vmatmul.mubr.msk.f32.vlgmr.msra.gmra.mxu1 %vm134_vm0, %v4048_v47  ;;  %3529 = vmatprep.subr.mxu0 %v3861_v18 }
0x1d24   :  { %3521 = vmatpush3.msra.mxu1 %v4084_v29  ;;  %3530 = vmatpush3.msra.mxu0 %v4092_v34 }
0x1d25   :  { %3522 = vmatprep.subr.mxu1 %v3861_v18  ;;  %3524 = vmatprep.mubr.msk.f32.mxu1 %vm3863_vm2, %v3861_v18 }
0x1d26   :  { %3523 = vmatpush3.msra.mxu1 %v4088_v30  ;;  %3553 = vmatprep.subr.mxu0 %v4201_v24 }
0x1d27   :  { %3534 = vmatprep.subr.mxu1 %v4492_v37 }
0x1de1   :  { %v3519_v41 = vpop.f32.mrf.mxu0 }
0x1de2   :  { %v2462_v34 = vsel %vm582_vm1, %v3519_v41, -inf }
0x1de3   :  { %v3514_v47 = vpop.f32.mrf.mxu1  ;;  %v2444_v27 = vpop.f32.mrf.mxu0 }
0x1de4   :  { %v2456_v50 = vsel %vm582_vm1, %v3514_v47, -inf  ;;  %v2459_v30 = vsel %vm582_vm1, %v2444_v27, -inf }
0x1de5   :  { %2457 = vmax.xlane.f32.xlu0 %v2456_v50  ;;  %v2366_v29 = vpop.f32.mrf.mxu1 }
0x1de6   :  { %v2453_v18 = vsel %vm582_vm1, %v2366_v29, -inf }
0x1de7   :  { %2454 = vmax.xlane.f32.xlu1 %v2453_v18 }
0x1de9   :  { %2460 = vmax.xlane.f32.xlu0 %v2459_v30 }
0x1ded   :  { %2463 = vmax.xlane.f32.xlu0 %v2462_v34 }
0x1e6e   :  { %v2458_v24 = vpop.xlane.xlu0 %2457 }
0x1e6f   :  { %v2466_v44 = vsub.f32 %v3514_v47, %v2458_v24 }
0x1e70   :  { %v2455_v48 = vpop.xlane.xlu1 %2454 }
0x1e71   :  { %v2471_v7 = vmul.f32 1.442695, %v2466_v44  ;;  %v2465_v12 = vsub.f32 %v2366_v29, %v2455_v48 }
0x1e72   :  { %v2461_v51 = vpop.xlane.xlu0 %2460 }
0x1e73   :  { %3687 = vpow2.f32 %v2471_v7  ;;  %v2469_v56 = vmul.f32 1.442695, %v2465_v12  ;;  %v2467_v0 = vsub.f32 %v2444_v27, %v2461_v51  ;;  %v3728_v7 = vld [vmem:[%s4620_s5 + $0x30] sm:$0xff]  ;;  %v3729_v12 = vld [vmem:[%s4620_s5 + $0x28] sm:$0xff] }
0x1e75   :  { %3689 = vpow2.f32 %v2469_v56  ;;  %v2473_v2 = vmul.f32 1.442695, %v2467_v0  ;;  %v3730_v56 = vld [vmem:[%s4620_s5 + $0x20] sm:$0xff]  ;;  %v3732_v0 = vld [vmem:[%s4620_s5 + $0x18] sm:$0xff] }
0x1e76   :  { %v2464_v3 = vpop.xlane.xlu0 %2463 }
0x1e77   :  { %3691 = vpow2.f32 %v2473_v2  ;;  %v2468_v52 = vsub.f32 %v3519_v41, %v2464_v3  ;;  %v3733_v2 = vld [vmem:[#allocation8 + $0x10] sm:$0xff]  ;;  %v3734_v3 = vld [vmem:[%s4620_s5 + $0x10] sm:$0xff] }
0x1e79   :  { %v2475_v4 = vmul.f32 1.442695, %v2468_v52  ;;  %v3735_v52 = vld [vmem:[#allocation8 + $0x8] sm:$0xff] }
0x1e7b   :  { %3693 = vpow2.f32 %v2475_v4  ;;  %v3736_v4 = vld [vmem:[%s4620_s5 + $0x8] sm:$0xff] }
0x1e80   :  { %v3688_v5 = vpop.eup %3687 }
0x1e81   :  { %v2480_v6 = vsel %vm582_vm1, %v3688_v5, 0.0 }
0x1e82   :  { %v3690_v9 = vpop.eup %3689  ;;  %2481 = vadd.xlane.f32.xlu0 %v2480_v6  ;;  %v3738_v6 = vld [vmem:[%s4620_s5] sm:$0xff] }
0x1e83   :  { %v2477_v43 = vsel %vm582_vm1, %v3690_v9, 0.0 }
0x1e84   :  { %v3692_v53 = vpop.eup %3691  ;;  %2478 = vadd.xlane.f32.xlu1 %v2477_v43 }
0x1e85   :  { %v2483_v54 = vsel %vm582_vm1, %v3692_v53, 0.0 }
0x1e88   :  { %v3694_v49 = vpop.eup %3693  ;;  %2484 = vadd.xlane.f32.xlu1 %v2483_v54 }
0x1e89   :  { %v2486_v59 = vsel %vm582_vm1, %v3694_v49, 0.0 }
0x1e8a   :  { %2487 = vadd.xlane.f32.xlu0 %v2486_v59 }
0x1f0b   :  { %v2482_v62 = vpop.xlane.xlu0 %2481 }
0x1f0c   :  { %3695 = vrcp.f32 %v2482_v62 }
0x1f0d   :  { %v2479_v11 = vpop.xlane.xlu1 %2478 }
0x1f0e   :  { %3697 = vrcp.f32 %v2479_v11 }
0x1f11   :  { %v2485_v20 = vpop.xlane.xlu1 %2484 }
0x1f12   :  { %3699 = vrcp.f32 %v2485_v20 }
0x1f13   :  { %v2488_v61 = vpop.xlane.xlu0 %2487 }
0x1f14   :  { %3701 = vrcp.f32 %v2488_v61 }
0x1f19   :  { %v3696_v63 = vpop.eup %3695 }
0x1f1a   :  { %v2494_v8 = vmul.f32 %v3696_v63, %v3688_v5  ;;  %v3737_v5 = vld [vmem:[#allocation8] sm:$0xff] }
0x1f1b   :  { %v3698_v14 = vpop.eup %3697 }
0x1f1c   :  { %v2498_v15 = vadd.f32 1e-08, %v2494_v8  ;;  %v2493_v19 = vmul.f32 %v3698_v14, %v3690_v9  ;;  %v4534_v9 = vld [vmem:[%s4622_s7 + $0x38] sm:$0xff] }
0x1f1e   :  { %v2497_v46 = vadd.f32 1e-08, %v2493_v19  ;;  %v2502_v21 = vsel %vm582_vm1, %v2498_v15, 0.0 }
0x1f1f   :  { %v3700_v16 = vpop.eup %3699 }
0x1f20   :  { %v2501_v17 = vsel %vm582_vm1, %v2497_v46, 0.0  ;;  %v2495_v1 = vmul.f32 %v3700_v16, %v3692_v53 }
0x1f21   :  { %v3702_v28 = vpop.eup %3701  ;;  %v2503_v23 = vadd.f32 %v2502_v21, %v2501_v17 }
0x1f22   :  { %v2496_v45 = vmul.f32 %v3702_v28, %v3694_v49  ;;  %v2499_v55 = vadd.f32 1e-08, %v2495_v1 }
0x1f23   :  { %v2504_v60 = vrot.slane %v2503_v23, 4 }
0x1f24   :  { %v2500_v26 = vadd.f32 1e-08, %v2496_v45  ;;  %v2510_v32 = vsel %vm582_vm1, %v2499_v55, 0.0 }
0x1f25   :  { %v2505_v31 = vadd.f32 %v2504_v60, %v2503_v23 }
0x1f26   :  { %v2511_v33 = vsel %vm582_vm1, %v2500_v26, 0.0 }
0x1f27   :  { %v2506_v25 = vrot.slane %v2505_v31, 2  ;;  %v2512_v35 = vadd.f32 %v2511_v33, %v2510_v32 }
0x1f29   :  { %v2507_v36 = vadd.f32 %v2506_v25, %v2505_v31  ;;  %v2513_v39 = vrot.slane %v2512_v35, 4 }
0x1f2b   :  { %v2508_v38 = vrot.slane %v2507_v36, 1  ;;  %v2514_v42 = vadd.f32 %v2513_v39, %v2512_v35 }
0x1f2d   :  { %v2509_v57 = vadd.f32 %v2508_v38, %v2507_v36  ;;  %v2515_v41 = vrot.slane %v2514_v42, 2 }
0x1f2f   :  { %3703 = vrcp.f32 %v2509_v57  ;;  %v2516_v47 = vadd.f32 %v2515_v41, %v2514_v42 }
0x1f31   :  { %v2517_v50 = vrot.slane %v2516_v47, 1 }
0x1f33   :  { %v2518_v27 = vadd.f32 %v2517_v50, %v2516_v47 }
0x1f35   :  { %3705 = vrcp.f32 %v2518_v27 }
0x1f3c   :  { %v3704_v29 = vpop.eup %3703 }
0x1f3d   :  { %v2521_v18 = vmul.f32 %v3704_v29, %v2497_v46  ;;  %v2522_v30 = vmul.f32 %v3704_v29, %v2498_v15 }
0x1f3f   :  { %2525 = vxpose.xlu1.b32.start [1/2] (short) (narrow) %v2521_v18, 8 }
0x1f42   :  { %v3706_v34 = vpop.eup %3705 }
0x1f43   :  { %2526 = vxpose.xlu1.b32.end [2/2] (short) (narrow) %v2522_v30, 8  ;;  %v2523_v24 = vmul.f32 %v3706_v34, %v2499_v55  ;;  %v2524_v44 = vmul.f32 %v3706_v34, %v2500_v26 }
0x1f45   :  { %2630 = vxpose.xlu0.b32.start [1/2] (short) (narrow) %v2523_v24, 8 }
0x1f49   :  { %2631 = vxpose.xlu0.b32.end [2/2] (short) (narrow) %v2524_v44, 8 }
0x1fbb   :  { %v2541_v48 = vpop.trf.xlu1 }
0x1fbc   :  { %3525 = vmatmul.mubr.msk.f32.vlgmr.msra.gmra.mxu1 %vm695_vm3, %v2541_v48 }
0x1fbd   :  { %3535 = vmatpush3.msra.mxu1 %v4492_v37  ;;  %v3731_v37 = vld [vmem:[#allocation8 + $0x18] sm:$0xff] }
0x1fbe   :  { %3536 = vmatprep.subr.mxu1 %v3728_v7 }
0x1fbf   :  { %3537 = vmatpush3.msra.mxu1 %v3728_v7 }
0x1fc0   :  { %3538 = vmatprep.subr.mxu1 %v3729_v12 }
0x1fc1   :  { %v2646_v51 = vpop.trf.xlu0  ;;  %3539 = vmatpush3.msra.mxu1 %v3729_v12 }
0x1fc2   :  { %3532 = vmatmul.mubr.msk.f32.vlgmr.msra.gmra.mxu0 %vm695_vm3, %v2646_v51  ;;  %3540 = vmatprep.subr.mxu1 %v3730_v56 }
0x1fc3   :  { %3541 = vmatpush3.msra.mxu1 %v3730_v56  ;;  %3554 = vmatpush3.msra.mxu0 %v3731_v37 }
0x1fc4   :  { %3542 = vmatprep.subr.mxu1 %v3732_v0  ;;  %3555 = vmatprep.subr.mxu0 %v3733_v2 }
0x1fc5   :  { %3543 = vmatpush3.msra.mxu1 %v3732_v0  ;;  %3556 = vmatpush3.msra.mxu0 %v3733_v2 }
0x1fc6   :  { %3544 = vmatprep.subr.mxu1 %v3734_v3  ;;  %3557 = vmatprep.subr.mxu0 %v3735_v52 }
0x1fc7   :  { %3545 = vmatpush3.msra.mxu1 %v3734_v3  ;;  %3558 = vmatpush3.msra.mxu0 %v3735_v52 }
0x1fc8   :  { %3546 = vmatprep.subr.mxu1 %v3736_v4  ;;  %3559 = vmatprep.subr.mxu0 %v3737_v5 }
0x1fc9   :  { %3547 = vmatpush3.msra.mxu1 %v3736_v4  ;;  %3560 = vmatpush3.msra.mxu0 %v3737_v5 }
0x1fca   :  { %3548 = vmatprep.subr.mxu1 %v3738_v6  ;;  %3564 = vmatprep.subr.mxu0 %v4534_v9 }
0x1fcb   :  { %3549 = vmatpush3.msra.mxu1 %v3738_v6 }
0x207c   :  { %v2626_v43 = vpop.f32.mrf.mxu1 }
0x207d   :  { %v2735_v53 = vsel %vm134_vm0, %v2626_v43, %v4446_v58 }
0x207e   :  { %3550 = vmatprep.mubr.msk.f32.mxu1 %vm892_vm4, %v2735_v53  ;;  %v3526_v54 = vpop.f32.mrf.mxu1 }
0x2082   :  { %v2731_v49 = vpop.f32.mrf.mxu0 }
0x2083   :  { %v2736_v59 = vsel %vm134_vm0, %v2731_v49, %v4442_v10 }
0x2084   :  { %v3533_v62 = vpop.f32.mrf.mxu0  ;;  %3551 = vmatmul.mubr.msk.f32.vlgmr.msra.gmra.mxu1 %vm892_vm4, %v2736_v59 }
0x2085   :  { %v3740_v62 = vld [vmem:[%s4622_s7 + $0x30] sm:$0xff] }
0x2144   :  { %v3552_v11 = vpop.f32.mrf.mxu1 }
0x2145   :  { %v2815_v20 = vadd.f32 %v3552_v11, %v4175_v40  ;;  %v3741_v11 = vld [vmem:[%s4622_s7 + $0x28] sm:$0xff] }
0x2146   :  { %v2809_v61 = vpop.f32.mrf.mxu1 }
0x2147   :  { %v2810_v63 = vadd.f32 %v2809_v61, %v4175_v40  ;;  %2834 = vrot.lane.b32.xlu1 %v2815_v20, %s3864_s14  ;;  %v3172_v14 = vmul.f32 -1.442695, %v2815_v20  ;;  %v3744_v61 = vld [vmem:[%s4622_s7 + $0x10] sm:$0xff] }
0x2149   :  { %2832 = vrot.lane.b32.xlu0 %v2810_v63, %s3864_s14  ;;  %v3171_v8 = vmul.f32 -1.442695, %v2810_v63 }
0x214b   :  { %3707 = vpow2.f32 %v3171_v8  ;;  %v3746_v8 = vld [vmem:[%s4622_s7] sm:$0xff] }
0x214c   :  { %3709 = vpow2.f32 %v3172_v14 }
0x2158   :  { %v3708_v15 = vpop.eup %3707 }
0x2159   :  { %v2824_v19 = vadd.f32 1.0, %v3708_v15  ;;  %v3710_v46 = vpop.eup %3709 }
0x215a   :  { %v2825_v16 = vadd.f32 1.0, %v3710_v46 }
0x215b   :  { %3711 = vrcp.f32 %v2824_v19 }
0x215c   :  { %3713 = vrcp.f32 %v2825_v16 }
0x2168   :  { %v3712_v17 = vpop.eup %3711 }
0x2169   :  { %v3714_v40 = vpop.eup %3713  ;;  %v2852_v33 = vsub.f32 1.0, %v3712_v17  ;;  %v2864_v35 = vmul.f32 %v3712_v17, %v4446_v58 }
0x216a   :  { %v2853_v38 = vsub.f32 1.0, %v3714_v40  ;;  %v2865_v57 = vmul.f32 %v3714_v40, %v4442_v10 }
0x21b9   :  { %v2835_v28 = vpop.permute.xlu1 %2834 }
0x21ba   :  { %v2839_v23 = vmul.f32 %v3714_v40, %v2835_v28 }
0x21bb   :  { %v2833_v21 = vpop.permute.xlu0 %2832 }
0x21bc   :  { %v2838_v1 = vmul.f32 %v3712_v17, %v2833_v21 }
0x21be   :  { %2842 = vrot.lane.b32.xlu1 %v2838_v1, %s3865_s26 }
0x21c2   :  { %2844 = vrot.lane.b32.xlu1 %v2839_v23, %s3865_s26 }
0x2230   :  { %v2843_v45 = vpop.permute.xlu1 %2842 }
0x2231   :  { %v2848_v55 = vadd.f32 %v2843_v45, %v2810_v63  ;;  %v3745_v63 = vld [vmem:[%s4622_s7 + $0x8] sm:$0xff] }
0x2233   :  { %3715 = vtanh.f32 %v2848_v55 }
0x2234   :  { %v2845_v60 = vpop.permute.xlu1 %2844 }
0x2235   :  { %v2849_v26 = vadd.f32 %v2845_v60, %v2815_v20  ;;  %v3742_v20 = vld [vmem:[%s4622_s7 + $0x20] sm:$0xff] }
0x2237   :  { %3717 = vtanh.f32 %v2849_v26 }
0x2240   :  { %v3716_v31 = vpop.eup %3715 }
0x2241   :  { %2856 = vrot.lane.b32.xlu1 %v3716_v31, %s3862_s0 }
0x2244   :  { %v3718_v32 = vpop.eup %3717 }
0x2245   :  { %2858 = vrot.lane.b32.xlu0 %v3718_v32, %s3862_s0 }
0x22b3   :  { %v2857_v25 = vpop.permute.xlu1 %2856 }
0x22b4   :  { %v2862_v36 = vmul.f32 %v2857_v25, %v2852_v33 }
0x22b6   :  { %v4552_v39 = vadd.f32 %v2864_v35, %v2862_v36 }
0x22b7   :  { %v2859_v42 = vpop.permute.xlu0 %2858 }
0x22b8   :  { %v2863_v41 = vmul.f32 %v2859_v42, %v2853_v38  ;;  %2870 = vrot.lane.b32.xlu1 %v4552_v39, %s3862_s0 }
0x22ba   :  { %v4557_v47 = vadd.f32 %v2865_v57, %v2863_v41 }
0x22bc   :  { %2872 = vrot.lane.b32.xlu0 %v4557_v47, %s3862_s0 }
0x232a   :  { %v2871_v50 = vpop.permute.xlu1 %2870 }
0x232b   :  { %v2876_v27 = vsel %vm134_vm0, %v2871_v50, 0.0 }
0x232c   :  { %2877 = vadd.xlane.f32.xlu1 %v2876_v27 }
0x232e   :  { %v2873_v58 = vpop.permute.xlu0 %2872 }
0x232f   :  { %v2879_v29 = vsel %vm134_vm0, %v2873_v58, 0.0 }
0x2330   :  { %2880 = vadd.xlane.f32.xlu0 %v2879_v29 }
0x23b5   :  { %v2878_v18 = vpop.xlane.xlu1 %2877 }
0x23b6   :  { %v2882_v30 = vmul.f32 0.03125, %v2878_v18 }
0x23b8   :  { %v2884_v10 = vsub.f32 %v4552_v39, %v2882_v30 }
0x23b9   :  { %v2881_v34 = vpop.xlane.xlu0 %2880 }
0x23ba   :  { %v2886_v24 = vmul.f32 %v2884_v10, %v2884_v10  ;;  %v2883_v44 = vmul.f32 0.03125, %v2881_v34 }
0x23bc   :  { %v2885_v48 = vsub.f32 %v4557_v47, %v2883_v44  ;;  %2890 = vrot.lane.b32.xlu0 %v2886_v24, %s3862_s0 }
0x23be   :  { %v2887_v7 = vmul.f32 %v2885_v48, %v2885_v48 }
0x23c0   :  { %2892 = vrot.lane.b32.xlu1 %v2887_v7, %s3862_s0 }
0x242e   :  { %v2891_v12 = vpop.permute.xlu0 %2890 }
0x242f   :  { %v2896_v51 = vsel %vm134_vm0, %v2891_v12, 0.0 }
0x2430   :  { %2897 = vadd.xlane.f32.xlu1 %v2896_v51 }
0x2432   :  { %v2893_v56 = vpop.permute.xlu1 %2892 }
0x2433   :  { %v2899_v37 = vsel %vm134_vm0, %v2893_v56, 0.0 }
0x2434   :  { %2900 = vadd.xlane.f32.xlu0 %v2899_v37 }
0x24b9   :  { %v2898_v0 = vpop.xlane.xlu1 %2897 }
0x24ba   :  { %v2902_v2 = vmul.f32 0.03125, %v2898_v0 }
0x24bc   :  { %v2904_v3 = vadd.f32 1e-05, %v2902_v2 }
0x24bd   :  { %v2901_v52 = vpop.xlane.xlu0 %2900 }
0x24be   :  { %3719 = vrsqrt.f32 %v2904_v3  ;;  %v2903_v4 = vmul.f32 0.03125, %v2901_v52 }
0x24c0   :  { %v2905_v5 = vadd.f32 1e-05, %v2903_v4 }
0x24c2   :  { %3721 = vrsqrt.f32 %v2905_v5 }
0x24cb   :  { %v3720_v6 = vpop.eup %3719 }
0x24cc   :  { %v2908_v43 = vmul.f32 %v3720_v6, %v2884_v10 }
0x24ce   :  { %2912 = vrot.lane.b32.xlu0 %v2908_v43, %s3862_s0 }
0x24cf   :  { %v3722_v53 = vpop.eup %3721 }
0x24d0   :  { %v2909_v54 = vmul.f32 %v3722_v53, %v2885_v48 }
0x24d2   :  { %2914 = vrot.lane.b32.xlu1 %v2909_v54, %s3862_s0 }
0x2540   :  { %v2913_v49 = vpop.permute.xlu0 %2912 }
0x2541   :  { %3561 = vmatprep.mubr.msk.f32.mxu0 %vm134_vm0, %v2913_v49 }
0x2544   :  { %v2915_v59 = vpop.permute.xlu1 %2914 }
0x2545   :  { %3562 = vmatmul.mubr.msk.f32.vlgmr.msra.gmra.mxu0 %vm134_vm0, %v2915_v59 }
0x2546   :  { %3565 = vmatpush3.msra.mxu0 %v4534_v9  ;;  %v3743_v9 = vld [vmem:[%s4622_s7 + $0x18] sm:$0xff]  ;;  %s3866_s7 = smov [#allocation10]  }
0x2547   :  { %3566 = vmatprep.subr.mxu0 %v3740_v62  ;;  %s3105_s6 = sshll.u32 %s3866_s7, 4  ;;  %s3106_s6 = int_to_ptr.vmem [resolvable:$true] %s3105_s6 }
0x2548   :  { %3567 = vmatpush3.msra.mxu0 %v3740_v62  ;;  %p3832_p7 = scmp.lt.s32.totalorder %s3106_s6, %s3106_s6 }
0x2549   :  { %3568 = vmatprep.subr.mxu0 %v3741_v11 }
0x254a   :  { %3569 = vmatpush3.msra.mxu0 %v3741_v11 }
0x254b   :  { %3570 = vmatprep.subr.mxu0 %v3742_v20 }
0x254c   :  { %3571 = vmatpush3.msra.mxu0 %v3742_v20 }
0x254d   :  { %3572 = vmatprep.subr.mxu0 %v3743_v9 }
0x254e   :  { %3573 = vmatpush3.msra.mxu0 %v3743_v9 }
0x254f   :  { %3574 = vmatprep.subr.mxu0 %v3744_v61 }
0x2550   :  { %3575 = vmatpush3.msra.mxu0 %v3744_v61 }
0x2551   :  { %3576 = vmatprep.subr.mxu0 %v3745_v63 }
0x2552   :  { %3577 = vmatpush3.msra.mxu0 %v3745_v63 }
0x2553   :  { %3578 = vmatprep.subr.mxu0 %v3746_v8 }
0x2554   :  { %3579 = vmatpush3.msra.mxu0 %v3746_v8 }
0x2605   :  { %v3563_v14 = vpop.f32.mrf.mxu0 }
0x2606   :  { %v2992_v15 = vadd.f32 %v3563_v14, %v4279_v13 }
0x2607   :  { %v2986_v19 = vpop.f32.mrf.mxu0 }
0x2608   :  { %v2987_v46 = vadd.f32 %v2986_v19, %v4279_v13  ;;  %v2996_v17 = vmax.f32 %v2992_v15, 0.0 }
0x260a   :  { %v2995_v16 = vmax.f32 %v2987_v46, 0.0 }
0x260c   :  { %3580 = vmatprep.mubr.msk.f32.mxu0 %vm892_vm4, %v2995_v16 }
0x260d   :  { %3581 = vmatmul.mubr.msk.f32.vlgmr.msra.gmra.mxu0 %vm892_vm4, %v2996_v17 }
0x26cd   :  { %v3582_v21 = vpop.f32.mrf.mxu0 }
0x26ce   :  { %3082 = vrot.lane.b32.xlu0 %v3582_v21, %s3864_s14 }
0x26cf   :  { %v3069_v1 = vpop.f32.mrf.mxu0 }
0x26d0   :  { %3080 = vrot.lane.b32.xlu1 %v3069_v1, %s3864_s14  ;;  %s3827_s14 = scalar_lea.vmem %s3106_s6, 256 }
0x26d1   :  { %p3828_p6 = scmp.ne.s32.totalorder %s3106_s6, %s3827_s14  ;;  %p3833_p8 = scmp.lt.s32.totalorder %s3827_s14, %s3827_s14 }
0x26d3   :  { %p3834_p9 = por %p3833_p8, %p3832_p7 }
0x26d5   :  { %p3835_p10 = pnand %p3834_p9, %p3828_p6 }
0x2740   :  { %v3083_v28 = vpop.permute.xlu0 %3082 }
0x2741   :  { %v3087_v40 = vadd.f32 %v3083_v28, %v4557_v47 }
0x2742   :  { %v3081_v23 = vpop.permute.xlu1 %3080 }
0x2743   :  { %v3089_v45 = vadd.f32 %v3087_v40, %v4294_v22  ;;  %v3086_v13 = vadd.f32 %v3081_v23, %v4552_v39 }
0x2745   :  { %v3088_v55 = vadd.f32 %v3086_v13, %v4294_v22  ;;  %3094 = vrot.lane.b32.xlu0 %v3089_v45, %s3862_s0 }
0x2747   :  { %3092 = vrot.lane.b32.xlu1 %v3088_v55, %s3862_s0 }
0x27b7   :  { %v3095_v60 = vpop.permute.xlu0 %3094 }
0x27b8   :  { %3099 = vst.msk [vmem:[#allocation10 + $0x8] sm:$0xff] %vm134_vm0, %v3095_v60 }
0x27b9   :  { %v3093_v26 = vpop.permute.xlu1 %3092 }
0x27ba   :  { %3098 = vst.msk [vmem:[#allocation10] sm:$0xff] %vm134_vm0, %v3093_v26 }
0x27bb   :  { %3838 = shalt.err (!%p3835_p10)
}
0x27bc   :  { %3111 = dma.vmem_to_hbm [thread:$0]  %s3106_s6, 256, %s4623_s8, [#allocation4], %s3857_s10, %s3857_s10, %s3858_s11  }
0x27bd   :  { %3853 = dma.done.wait [#allocation4], 256  }
0x27be   :  { %3854 = vsyncadd [#allocation4], 4294967040 }
0x27bf   :  { %3115 = vsyncpa [#allocation3], 1 }
0x27c0   :  { %3116 = vsyncpa [#allocation6], 1 }
0x27c1   :  { %3117 = vsyncpa [#allocation9], 1 }
0x27c2   :  { %3118 = vsyncpa [#allocation4], 1 }

</bundles_post_ra>
